<compile_context>
chip_gen: v7x
topology: tpu7x:2x2x1
jax: 0.10.0
libtpu: 0.0.40
codegen_flags: <defaults>
</compile_context>

<pallas_src>
import jax
import jax.numpy as jnp
from jax.experimental import pallas as pl
from jax.experimental.pallas import tpu as pltpu

NUM_BYTES = 3
VOCAB = (20, 2048, 4096)
NEG_INF_PAD = -1e30  # do NOT use -inf (would create inf-inf / 0*inf NaNs)


def _round_up(x, m):
    return ((x + m - 1) // m) * m


# ----------------------------- Pallas kernel -------------------------------

def _fused_head_kernel(x_ref, wsel_ref, w_ref, b_ref, out_ref):
    """LayerNorm(eps=1e-6, no affine) + head linear + per-row LSE - picked dot.

    Grid: (head [parallel], row_tile [parallel]).
      x_ref    : (tm, W)        f32   rows for this head (lane band of x2)
      wsel_ref : (tm, W)        bf16  label weight column per row (same band)
      w_ref    : (1, W, V_pad)  bf16  this head's full (padded) weight
      b_ref    : (1, 1, V_pad)  f32   this head's bias (padded cols = -1e30)
      out_ref  : (1, tm, 1)     f32   lse - xn . w[:, label]   (bias at label
                                      is added back in the wrapper)
    """
    x = x_ref[...]                                       # (tm, W) f32
    mean = jnp.mean(x, axis=-1, keepdims=True)
    xc = x - mean
    var = jnp.mean(xc * xc, axis=-1, keepdims=True)
    xn = (xc * jax.lax.rsqrt(var + 1e-6)).astype(jnp.bfloat16)

    # (tm, V_pad) logits: bf16 MXU, f32 accumulation. Padded columns have
    # weight 0 and bias -1e30 so they never win the max / contribute to LSE.
    logits = jnp.dot(xn, w_ref[0], preferred_element_type=jnp.float32) + b_ref[0]

    m = jnp.max(logits, axis=-1, keepdims=True)
    lse = m + jnp.log(jnp.sum(jnp.exp(logits - m), axis=-1, keepdims=True))

    # Picked (label) logit without bias: W-wide VPU dot, not a V-wide pick.
    picked = jnp.sum(xn.astype(jnp.float32) * wsel_ref[...].astype(jnp.float32),
                     axis=-1, keepdims=True)

    out_ref[0] = lse - picked


def fused_heads_loss(x2, wsel, w_packed, b_packed, *, tm_max=256):
    """Per-row (lse - picked_weight_dot) for all heads in one pallas_call.

    x2       : (N, H*W) f32   rows, head h in lane band [h*W, (h+1)*W)
    wsel     : (N, H*W) bf16  gathered label weight columns, same banding
    w_packed : (H, W, V_pad) bf16
    b_packed : (H, 1, V_pad) f32
    returns  : (H, N) f32
    """
    N, threeW = x2.shape
    H, W, V_pad = w_packed.shape
    assert threeW == H * W and W % 128 == 0 and V_pad % 128 == 0

    # Row tile: multiple of 8 sublanes; small problems use a single tile.
    tm = min(tm_max, _round_up(N, 8))
    N_pad = _round_up(N, tm)
    if N_pad != N:
        x2 = jnp.pad(x2, ((0, N_pad - N), (0, 0)))
        wsel = jnp.pad(wsel, ((0, N_pad - N), (0, 0)))

    grid = (H, N_pad // tm)  # row_tile innermost -> weight fetched once/head

    out = pl.pallas_call(
        _fused_head_kernel,
        out_shape=jax.ShapeDtypeStruct((H, N_pad, 1), jnp.float32),
        grid_spec=pltpu.PrefetchScalarGridSpec(
            num_scalar_prefetch=0,
            grid=grid,
            in_specs=[
                pl.BlockSpec((tm, W), lambda h, i: (i, h)),            # x band
                pl.BlockSpec((tm, W), lambda h, i: (i, h)),            # wsel band
                pl.BlockSpec((1, W, V_pad), lambda h, i: (h, 0, 0)),   # weight
                pl.BlockSpec((1, 1, V_pad), lambda h, i: (h, 0, 0)),   # bias
            ],
            out_specs=pl.BlockSpec((1, tm, 1), lambda h, i: (h, i, 0)),
        ),
        compiler_params=pltpu.CompilerParams(
            dimension_semantics=("parallel", "parallel"),
            vmem_limit_bytes=32 * 1024 * 1024),
    )(x2.astype(jnp.float32), wsel.astype(jnp.bfloat16), w_packed, b_packed)
    return out[:, :N, 0]


# ------------------------------ JAX glue ----------------------------------

def feature2byte(x, lower_exp=122, upper_exp=131):
    """ByteConverter.feature2byte: float32 -> (..., 3) int32 byte codes."""
    int_repr = jax.lax.bitcast_convert_type(x.astype(jnp.float32), jnp.int32)[..., None]
    shifts = jnp.array([31, 23, 12, 0], dtype=jnp.int32)
    consts = jnp.array([1, 255, 2047, 4095], dtype=jnp.int32)
    bytes_t = jnp.right_shift(int_repr, shifts) & consts  # (..., 4) int32
    b_exp = jnp.clip(bytes_t[..., 1], lower_exp, upper_exp) - lower_exp
    b_exp = b_exp + bytes_t[..., 0] * (upper_exp - lower_exp + 1)
    return jnp.stack([b_exp, bytes_t[..., 2], bytes_t[..., 3]], axis=-1)


def init_params(key, token_embed_dim, decoder_embed_dim, inner_ar_width):
    T, D, W = token_embed_dim, decoder_embed_dim, inner_ar_width
    ks = jax.random.split(key, 16)
    std = 0.02
    V_pad = _round_up(max(VOCAB), 128)

    head_w = [std * jax.random.normal(ks[7 + i], (W, VOCAB[i]), jnp.float32)
              for i in range(NUM_BYTES)]
    head_b = [jnp.zeros((VOCAB[i],), jnp.float32) for i in range(NUM_BYTES)]

    # Pre-cast to bf16 and pre-pad ONCE (not per forward):
    #   head_w_packed: (3, W, V_pad) bf16, zero-padded columns
    #   head_b_packed: (3, 1, V_pad) f32, padded columns = -1e30
    #   head_wT:       per-head (V_i, W) bf16 for the label-column gather
    w_packed = jnp.stack(
        [jnp.pad(head_w[i].astype(jnp.bfloat16), ((0, 0), (0, V_pad - VOCAB[i])))
         for i in range(NUM_BYTES)], axis=0)
    b_packed = jnp.stack(
        [jnp.pad(head_b[i], (0, V_pad - VOCAB[i]),
                 constant_values=NEG_INF_PAD).reshape(1, V_pad)
         for i in range(NUM_BYTES)], axis=0)

    params = {
        "word_embed": [std * jax.random.normal(ks[i], (VOCAB[i], W), jnp.float32)
                       for i in range(NUM_BYTES)],
        "cond_proj_w": std * jax.random.normal(ks[3], (D, W), jnp.float32),
        "cond_proj_b": jnp.zeros((W,), jnp.float32),
        "start_token": std * jax.random.normal(ks[4], (1, 1, W), jnp.float32),
        "pos_embedding": std * jax.random.normal(ks[5], (1, T * NUM_BYTES, W),
                                                 jnp.float32),
        "level_embed": std * jax.random.normal(ks[6], (NUM_BYTES, W), jnp.float32),
        "head_w_packed": w_packed,
        "head_b_packed": b_packed,
        "head_wT": [head_w[i].astype(jnp.bfloat16).T for i in range(NUM_BYTES)],
        "head_b": head_b,
    }
    return params


def arhead_byte_forward(params, z, target, mask=None):
    """z: (B, decoder_embed_dim) f32, target: (B, token_embed_dim) f32."""
    bsz, T = target.shape
    W = params["start_token"].shape[-1]
    N = bsz * T

    tgt_bytes = feature2byte(target)  # (B, T, 3) int32

    # word embeddings, interleaved per token: [b0, b1, b2, b0, b1, b2, ...]
    embs = [jnp.take(params["word_embed"][i], tgt_bytes[..., i], axis=0)
            for i in range(NUM_BYTES)]                       # each (B, T, W)
    inp = jnp.stack(embs, axis=2).reshape(bsz, T * NUM_BYTES, W)

    # cond_proj is tiny (B x D @ D x W): plain XLA, fused with the adds.
    cond = z @ params["cond_proj_w"] + params["cond_proj_b"]  # (B, W)
    start = cond[:, None, :] + params["start_token"]          # (B, 1, W)

    loc_ids = jnp.tile(jnp.arange(NUM_BYTES, dtype=jnp.int32), T)       # (3T,)
    level_pos = jnp.take(params["level_embed"], loc_ids, axis=0)[None]  # (1,3T,W)

    x = (jnp.concatenate([start, inp[:, :-1]], axis=1)
         + level_pos + params["pos_embedding"])               # (B, 3T, W)

    # TODO(synk): AdaLNSelfAttn transformer blocks are not defined in the
    # provided reference source, so they are skipped (identity) here.

    # (B, 3T, W) -> (B*T, 3*W): contiguous reshape (no transpose / HBM round
    # trip); head h lives in lane band [h*W, (h+1)*W) and is selected by the
    # kernel's BlockSpec.
    x2 = x.reshape(N, NUM_BYTES * W)
    labels = tgt_bytes.reshape(N, NUM_BYTES)                  # (N, 3) int32

    # Gather each row's label weight column / bias (tiny) for the picked-logit
    # dot; uses the SAME bf16 weight values as the in-kernel matmul.
    wsel = jnp.concatenate(
        [jnp.take(params["head_wT"][h], labels[:, h], axis=0)
         for h in range(NUM_BYTES)], axis=-1)                 # (N, 3W) bf16
    bsel = jnp.stack(
        [jnp.take(params["head_b"][h], labels[:, h]) for h in range(NUM_BYTES)],
        axis=0)                                               # (3, N) f32

    lse_minus_dot = fused_heads_loss(
        x2, wsel, params["head_w_packed"], params["head_b_packed"])  # (3, N)

    losses = (lse_minus_dot - bsel).reshape(NUM_BYTES, bsz, T)  # per-row CE

    # Head 1: zero positions where the exponent byte of the same token == 7 mod 8.
    drop1 = (tgt_bytes[..., 0] % 8) == 7                       # (B, T)
    losses = losses.at[1].set(jnp.where(drop1, 0.0, losses[1]))

    per_b = losses.mean(-1)   # (3, B)  (divides by T incl. zeroed, as reference)
    if mask is not None:
        per_head = (per_b * mask[None, :]).sum(-1) / mask.sum()
    else:
        per_head = per_b.mean(-1)
    return per_head.sum() / NUM_BYTES


# --------------------------------- main ------------------------------------

if __name__ == "__main__":
    bsz = 2
    token_embed_dim = 8       # T
    decoder_embed_dim = 32    # D
    inner_ar_width = 128      # W (lane-aligned)

    key = jax.random.PRNGKey(0)
    k_params, k_z, k_t = jax.random.split(key, 3)

    params = init_params(k_params, token_embed_dim, decoder_embed_dim, inner_ar_width)
    z = jax.random.normal(k_z, (bsz, decoder_embed_dim), jnp.float32)
    target = jax.random.normal(k_t, (bsz, token_embed_dim), jnp.float32)

    loss = jax.jit(arhead_byte_forward)(params, z, target)
    jax.block_until_ready(loss)
    print("KERNEL_OK")
</pallas_src>

<mosaic_0001>
module attributes {stable_mosaic.version = 11 : i64} {
  func.func @_fused_head_kernel(%arg0: i32, %arg1: i32, %arg2: memref<16x128xf32, #tpu.memory_space<vmem>>, %arg3: memref<16x128xbf16, #tpu.memory_space<vmem>>, %arg4: memref<1x128x4096xbf16, #tpu.memory_space<vmem>>, %arg5: memref<1x1x4096xf32, #tpu.memory_space<vmem>>, %arg6: memref<1x16x1xf32, #tpu.memory_space<vmem>>) attributes {dimension_semantics = [#tpu.dimension_semantics<parallel>, #tpu.dimension_semantics<parallel>], iteration_bounds = array<i64: 3, 1>, scalar_prefetch = 0 : i64, scratch_operands = 0 : i64, tpu.core_type = #tpu.core_type<tc>, window_params = [{transform_indices = @transform_0, window_bounds = array<i64: 16, 128>}, {transform_indices = @transform_1, window_bounds = array<i64: 16, 128>}, {transform_indices = @transform_2, window_bounds = array<i64: 1, 128, 4096>}, {transform_indices = @transform_3, window_bounds = array<i64: 1, 1, 4096>}, {transform_indices = @transform_4, window_bounds = array<i64: 1, 16, 1>}]} {
    %c0 = arith.constant 0 : index
    %c0_0 = arith.constant 0 : index
    %0 = vector.load %arg2[%c0, %c0_0] : memref<16x128xf32, #tpu.memory_space<vmem>>, vector<16x128xf32>
    %cst = arith.constant dense<0.000000e+00> : vector<16xf32>
    %1 = vector.multi_reduction <add>, %0, %cst [1] : vector<16x128xf32> to vector<16xf32>
    %2 = vector.shape_cast %1 : vector<16xf32> to vector<16x1xf32>
    %cst_1 = arith.constant 1.280000e+02 : f32
    %3 = vector.broadcast %cst_1 : f32 to vector<16x1xf32>
    %4 = arith.divf %2, %3 : vector<16x1xf32>
    %5 = vector.broadcast %4 : vector<16x1xf32> to vector<16x128xf32>
    %6 = arith.subf %0, %5 : vector<16x128xf32>
    %7 = arith.mulf %6, %6 : vector<16x128xf32>
    %cst_2 = arith.constant dense<0.000000e+00> : vector<16xf32>
    %8 = vector.multi_reduction <add>, %7, %cst_2 [1] : vector<16x128xf32> to vector<16xf32>
    %9 = vector.shape_cast %8 : vector<16xf32> to vector<16x1xf32>
    %cst_3 = arith.constant 1.280000e+02 : f32
    %10 = vector.broadcast %cst_3 : f32 to vector<16x1xf32>
    %11 = arith.divf %9, %10 : vector<16x1xf32>
    %cst_4 = arith.constant 9.99999997E-7 : f32
    %12 = vector.broadcast %cst_4 : f32 to vector<16x1xf32>
    %13 = arith.addf %11, %12 : vector<16x1xf32>
    %14 = math.rsqrt %13 : vector<16x1xf32>
    %15 = vector.broadcast %14 : vector<16x1xf32> to vector<16x128xf32>
    %16 = arith.mulf %6, %15 : vector<16x128xf32>
    %17 = arith.truncf %16 : vector<16x128xf32> to vector<16x128xbf16>
    %c0_5 = arith.constant 0 : index
    %c0_6 = arith.constant 0 : index
    %c0_7 = arith.constant 0 : index
    %18 = vector.load %arg4[%c0_5, %c0_6, %c0_7] : memref<1x128x4096xbf16, #tpu.memory_space<vmem>>, vector<1x128x4096xbf16>
    %19 = vector.shape_cast %18 : vector<1x128x4096xbf16> to vector<128x4096xbf16>
    %cst_8 = arith.constant dense<0.000000e+00> : vector<16x4096xf32>
    %20 = tpu.matmul %17, %19, %cst_8 {dimension_numbers = #tpu.dot_dimension_numbers<[1], [0], [0], [1], [0, 0, 1, 1], [], []>} : vector<16x128xbf16>, vector<128x4096xbf16>, vector<16x4096xf32> -> vector<16x4096xf32>
    %c0_9 = arith.constant 0 : index
    %c0_10 = arith.constant 0 : index
    %c0_11 = arith.constant 0 : index
    %21 = vector.load %arg5[%c0_9, %c0_10, %c0_11] : memref<1x1x4096xf32, #tpu.memory_space<vmem>>, vector<1x1x4096xf32>
    %22 = vector.shape_cast %21 : vector<1x1x4096xf32> to vector<1x4096xf32>
    %23 = vector.broadcast %22 : vector<1x4096xf32> to vector<16x4096xf32>
    %24 = arith.addf %20, %23 : vector<16x4096xf32>
    %cst_12 = arith.constant dense<0xFF800000> : vector<16xf32>
    %25 = vector.multi_reduction <maximumf>, %24, %cst_12 [1] : vector<16x4096xf32> to vector<16xf32>
    %26 = vector.shape_cast %25 : vector<16xf32> to vector<16x1xf32>
    %27 = vector.broadcast %26 : vector<16x1xf32> to vector<16x4096xf32>
    %28 = arith.subf %24, %27 : vector<16x4096xf32>
    %29 = math.exp %28 : vector<16x4096xf32>
    %cst_13 = arith.constant dense<0.000000e+00> : vector<16xf32>
    %30 = vector.multi_reduction <add>, %29, %cst_13 [1] : vector<16x4096xf32> to vector<16xf32>
    %31 = vector.shape_cast %30 : vector<16xf32> to vector<16x1xf32>
    %32 = math.log %31 : vector<16x1xf32>
    %33 = arith.addf %26, %32 : vector<16x1xf32>
    %34 = arith.extf %17 : vector<16x128xbf16> to vector<16x128xf32>
    %c0_14 = arith.constant 0 : index
    %c0_15 = arith.constant 0 : index
    %35 = vector.load %arg3[%c0_14, %c0_15] : memref<16x128xbf16, #tpu.memory_space<vmem>>, vector<16x128xbf16>
    %36 = arith.extf %35 : vector<16x128xbf16> to vector<16x128xf32>
    %37 = arith.mulf %34, %36 : vector<16x128xf32>
    %cst_16 = arith.constant dense<0.000000e+00> : vector<16xf32>
    %38 = vector.multi_reduction <add>, %37, %cst_16 [1] : vector<16x128xf32> to vector<16xf32>
    %39 = vector.shape_cast %38 : vector<16xf32> to vector<16x1xf32>
    %40 = arith.subf %33, %39 : vector<16x1xf32>
    %c0_17 = arith.constant 0 : index
    %c0_18 = arith.constant 0 : index
    %c0_19 = arith.constant 0 : index
    %41 = vector.load %arg6[%c0_17, %c0_18, %c0_19] : memref<1x16x1xf32, #tpu.memory_space<vmem>>, vector<1x16x1xf32>
    %42 = vector.shape_cast %41 : vector<1x16x1xf32> to vector<16x1xf32>
    %43 = vector.shape_cast %40 : vector<16x1xf32> to vector<1x16x1xf32>
    tpu.vector_store %arg6[%c0_17, %c0_18, %c0_19], %43 {strides = array<i32>} : memref<1x16x1xf32, #tpu.memory_space<vmem>>, vector<1x16x1xf32>,
    return
  }
  func.func @transform_0(%arg0: i32, %arg1: i32) -> (i32, i32) {
    %c0_i32 = arith.constant 0 : i32
    return %arg1, %arg0 : i32, i32
  }
  func.func @transform_1(%arg0: i32, %arg1: i32) -> (i32, i32) {
    %c0_i32 = arith.constant 0 : i32
    return %arg1, %arg0 : i32, i32
  }
  func.func @transform_2(%arg0: i32, %arg1: i32) -> (i32, i32, i32) {
    %c0_i32 = arith.constant 0 : i32
    %c0_i32_0 = arith.constant 0 : i32
    %c0_i32_1 = arith.constant 0 : i32
    return %arg0, %c0_i32, %c0_i32_0 : i32, i32, i32
  }
  func.func @transform_3(%arg0: i32, %arg1: i32) -> (i32, i32, i32) {
    %c0_i32 = arith.constant 0 : i32
    %c0_i32_0 = arith.constant 0 : i32
    %c0_i32_1 = arith.constant 0 : i32
    return %arg0, %c0_i32, %c0_i32_0 : i32, i32, i32
  }
  func.func @transform_4(%arg0: i32, %arg1: i32) -> (i32, i32, i32) {
    %c0_i32 = arith.constant 0 : i32
    %c0_i32_0 = arith.constant 0 : i32
    return %arg0, %arg1, %c0_i32 : i32, i32, i32
  }
}

</mosaic_0001>

<bundles_post_ra>
// kernel: arhead_byte_forward.1
= control target key start
LH: loop header
LB: loop body
LE: loop exit
PB: predicated region body
PF: predicated region fallthrough
CT: control target
= control target key end

     0   :  { %9 = vsyncpa [#allocation5], 0  ;;  %s4973_s0 = inlined_call_operand.vmem [shape: f32[16,384], index: 0, kind: input, shape index: {}]   ;;  %s4974_s1 = inlined_call_operand.vmem [shape: bf16[16,384], index: 1, kind: input, shape index: {}]   ;;  %s4975_s2 = inlined_call_operand.hbm [shape: bf16[3,128,4096], index: 2, kind: input, shape index: {}]   ;;  %s4976_s3 = inlined_call_operand.hbm [shape: f32[3,1,4096], index: 3, kind: input, shape index: {}]   ;;  %s4977_s4 = inlined_call_operand.vmem [shape: f32[3,16,1], index: 4, kind: output, shape index: {}]  }
   0x1   :  { %11 = vsyncpa [#allocation5 + $0x1], 0 }
   0x2   :  { %12 = vsyncpa [#allocation7], 0 }
   0x3   :  { %14 = vsyncpa [#allocation7 + $0x1], 0  ;;  %s3954_s15 = smov 0   ;;  %s3956_s16 = smov 0  }
   0x4   :  { %s3958_s17 = smov 0   ;;  %s3960_s18 = smov 0  }
   0x5   :  { %s3962_s19 = smov 0   ;;  %s3964_s20 = smov 0  }
   0x6 LB: > { %s3335_s21 = sadd.s32 4294967295, %s3922_s20   ;;  %s32_s22 = sadd.s32 1, %s3918_s19  ;;  %s3922_s20 = sphi %s3964_s20, %s20_s20   ;;  %s3918_s19 = sphi %s3962_s19, %s5058_s19   ;;  %s3914_s18 = sphi %s3960_s18, %s5057_s18   ;;  %s3910_s17 = sphi %s3958_s17, %s5056_s17   ;;  %s3906_s16 = sphi %s3956_s16, %s5055_s16   ;;  %s3902_s15 = sphi %s3954_s15, %s5054_s15  }
   0x7   : > { %p34_p0 = scmp.ge.s32.totalorder %s32_s22, 3  ;;  %s41_s23 = sadd.s32 1, %s3910_s17 }
   0x8   : > { %p48_p1 = scmp.ne.s32.totalorder %s3910_s17, %s3906_s16  ;;  %p49_p2 = scmp.eq.s32.totalorder %s3922_s20, 0 }
   0x9   : > { %s5060_s22 = smov (%p34_p0, %s32_s22), 0  ;;  %p108_p4 = scmp.ne.s32.totalorder %s3906_s16, %s3902_s15 }
   0xa   : > { %p3990_p3 = por %p49_p2, %p48_p1  ;;  %s37_s25 = ssub.s32 %s3918_s19, %s5060_s22 }
   0xb   : > { %p109_p5 = scmp.eq.s32.totalorder %s3335_s21, 0  ;;  %p39_p6 = scmp.eq.s32.totalorder %s37_s25, 0 }
   0xc   : > { %p3338_p8 = scmp.ge.s32.totalorder %s3922_s20, 3 }
   0xd   : > { %p3997_p7 = por %p109_p5, %p108_p4 }
   0xe   : > { %s4002_s27 = scalar_select %p39_p6, %s3910_s17, %s41_s23  }
   0xf   : > { %s5000_s26 = scalar_select %p3997_p7, 1, 0 }
  0x10   : > { %182 = sbr.rel (%p3338_p8) target bundleno = 88 (0x58), region = 16 }
  0x17   : > { %185 = sbr.rel (!%p3990_p3) target bundleno = 30 (0x1e), region = 20  ;;  %s187_s28 = sand.u32 (%p3990_p3), 1, %s3910_s17  }
  0x18   : > { %s3340_s29 = sshll.u32 (%p3990_p3), %s3918_s19, 3  ;;  %s3339_s30 = sshll.u32 (%p3990_p3), %s187_s28, 4 }
  0x19   : > { %s194_s7 = scalar_lea.vmem (%p3990_p3), %s4973_s0, %s3340_s29  ;;  %s189_s8 = scalar_lea.vmem (%p3990_p3), [#allocation2], %s3339_s30 }
  0x1a   : > { %v224_v0 = vld [vmem:[%s194_s7] sm:$0xff] (%p3990_p3)  ;;  %v226_v1 = vld [vmem:[%s194_s7 + $0x18] sm:$0xff] (%p3990_p3) }
  0x1b   : > { %225 = vst [vmem:[%s189_s8] sm:$0xff] (%p3990_p3), %v224_v0  ;;  %227 = vst [vmem:[%s189_s8 + $0x8] sm:$0xff] (%p3990_p3), %v226_v1 }
  0x1e PF: > { %233 = sbr.rel (!%p3990_p3) target bundleno = 37 (0x25), region = 58  ;;  %s235_s9 = sand.u32 (%p3990_p3), 1, %s3910_s17  }
  0x1f   : > { %s3342_s10 = sshll.u32 (%p3990_p3), %s3918_s19, 2  ;;  %s3341_s11 = sshll.u32 (%p3990_p3), %s235_s9, 3 }
  0x20   : > { %s242_s14 = scalar_lea.vmem (%p3990_p3), %s4974_s1, %s3342_s10  ;;  %s237_s15 = scalar_lea.vmem (%p3990_p3), [#allocation3], %s3341_s11 }
  0x21   : > { %v258_v2 = vld [vmem:[%s242_s14] sm:$0xf] (%p3990_p3)  ;;  %v260_v3 = vld [vmem:[%s242_s14 + $0xc] sm:$0xf] (%p3990_p3) }
  0x22   : > { %259 = vst [vmem:[%s237_s15] sm:$0xf] (%p3990_p3), %v258_v2  ;;  %261 = vst [vmem:[%s237_s15 + $0x4] sm:$0xf] (%p3990_p3), %v260_v3 }
  0x25 PF: > { %s4020_s21 = sand.u32 1, %s3910_s17   ;;  %s3614_s23 = sshll.u32 %s3918_s19, 15 }
  0x26   : > { %s3343_s25 = sshll.u32 %s4020_s21, 11  ;;  %s4027_s30 = scalar_lea.hbm %s4975_s2, %s3614_s23 }
  0x27   : > { %s293_s5 = scalar_lea.vmem [#allocation4], %s3343_s25  ;;  %s290_s7 = scalar_lea.sflag [#allocation5], %s4020_s21 }
  0x28   : > { %s300_s6 = sshll.u32 %s293_s5, 4  ;;  %s3812_s8 = scalar_lea.hbm %s4027_s30, 32768  ;;  %s4029_s6 = int_to_ptr.vmem [resolvable:$true] %s300_s6 }
  0x29   : > { %p3813_p9 = scmp.ne.s32.totalorder %s4027_s30, %s3812_s8  ;;  %s3816_s11 = scalar_lea.hbm %s4975_s2, 98304 }
  0x2a   : > { %p3817_p12 = scmp.lt.u32.totalorder %s4027_s30, %s4975_s2  ;;  %p3818_p13 = scmp.lt.u32.totalorder %s3816_s11, %s3812_s8 }
  0x2b   : > { %p3814_p10 = pnand %p3813_p9, %p3990_p3  ;;  %p3820_p1 = scmp.lt.u32.totalorder %s3812_s8, %s4027_s30 }
  0x2c   : > { %p3819_p0 = por %p3818_p13, %p3817_p12 }
  0x2d   : > { %p3815_p11 = pneg %p3814_p10 }
  0x2e   : > { %p3821_p2 = por %p3820_p1, %p3819_p0 }
  0x30   : > { %p3822_p4 = pnand %p3821_p2, %p3815_p11 }
  0x32   : > { %3825 = shalt.err (!%p3822_p4)
}
  0x33   : > { %s3826_s14 = scalar_lea.vmem %s4029_s6, 32768  ;;  %s3924_s15 = smov [#allocation4]  }
  0x34   : > { %p3827_p5 = scmp.ne.s32.totalorder %s4029_s6, %s3826_s14  ;;  %s3830_s23 = sshll.u32 %s3924_s15, 4  ;;  %s3831_s23 = int_to_ptr.vmem [resolvable:$false] %s3830_s23 }
  0x35   : > { %s3832_s25 = scalar_lea.vmem %s3831_s23, 65536  ;;  %p3833_p9 = scmp.lt.s32.totalorder %s4029_s6, %s3831_s23 }
  0x36   : > { %p3828_p6 = pnand %p3827_p5, %p3990_p3  ;;  %p3834_p10 = scmp.lt.s32.totalorder %s3832_s25, %s3826_s14 }
  0x38   : > { %p3829_p8 = pneg %p3828_p6  ;;  %p3835_p12 = por %p3834_p10, %p3833_p9 }
  0x3a   : > { %p3836_p13 = pnand %p3835_p12, %p3829_p8 }
  0x3c   : > { %3839 = shalt.err (!%p3836_p13)
}
  0x3d   : > { %s3925_s28 = smov 2048   ;;  %s3926_s29 = smov 128  }
  0x3e   : > { %3621 = dma.hbm_to_vmem [thread:$0]  (%p3990_p3), %s4027_s30, 32768, %s4029_s6, %s290_s7, %s3925_s28, %s3925_s28, %s3926_s29  }
  0x3f   : > { %s3346_s5 = sshll.u32 %s4020_s21, 5  ;;  %s3615_s8 = sshll.u32 %s3918_s19, 9 }
  0x40   : > { %s4060_s11 = scalar_lea.hbm %s4976_s3, %s3615_s8  ;;  %s314_s12 = scalar_lea.vmem [#allocation6], %s3346_s5 }
  0x41   : > { %s322_s13 = sshll.u32 %s314_s12, 4  ;;  %s311_s14 = scalar_lea.sflag [#allocation7], %s4020_s21  ;;  %s323_s13 = int_to_ptr.vmem [resolvable:$true] %s322_s13 }
  0x42   : > { %s3840_s15 = scalar_lea.hbm %s4060_s11, 512  ;;  %s3844_s7 = scalar_lea.hbm %s4976_s3, 1536 }
  0x43   : > { %p3841_p11 = scmp.ne.s32.totalorder %s4060_s11, %s3840_s15  ;;  %p3845_p2 = scmp.lt.u32.totalorder %s4060_s11, %s4976_s3 }
  0x44   : > { %p3846_p4 = scmp.lt.u32.totalorder %s3844_s7, %s3840_s15  ;;  %p3848_p6 = scmp.lt.u32.totalorder %s3840_s15, %s4060_s11 }
  0x45   : > { %p3842_p0 = pnand %p3841_p11, %p3990_p3 }
  0x46   : > { %p3847_p5 = por %p3846_p4, %p3845_p2 }
  0x47   : > { %p3843_p1 = pneg %p3842_p0 }
  0x48   : > { %p3849_p8 = por %p3848_p6, %p3847_p5 }
  0x4a   : > { %p3850_p9 = pnand %p3849_p8, %p3843_p1 }
  0x4c   : > { %3853 = shalt.err (!%p3850_p9)
}
  0x4d   : > { %s3854_s21 = scalar_lea.vmem %s323_s13, 512  ;;  %s3927_s28 = smov [#allocation6]  }
  0x4e   : > { %p3855_p10 = scmp.ne.s32.totalorder %s323_s13, %s3854_s21  ;;  %s3858_s29 = sshll.u32 %s3927_s28, 4  ;;  %s3859_s29 = int_to_ptr.vmem [resolvable:$false] %s3858_s29 }
  0x4f   : > { %s3860_s5 = scalar_lea.vmem %s3859_s29, 1024  ;;  %p3861_p11 = scmp.lt.s32.totalorder %s323_s13, %s3859_s29 }
  0x50   : > { %p3856_p12 = pnand %p3855_p10, %p3990_p3  ;;  %p3862_p0 = scmp.lt.s32.totalorder %s3860_s5, %s3854_s21 }
  0x52   : > { %p3857_p13 = pneg %p3856_p12  ;;  %p3863_p7 = por %p3862_p0, %p3861_p11 }
  0x54   : > { %p3864_p2 = pnand %p3863_p7, %p3857_p13 }
  0x56   : > { %3867 = shalt.err (!%p3864_p2)
}
  0x57   : > { %3622 = dma.hbm_to_vmem [thread:$0]  (%p3990_p3), %s4060_s11, 512, %s323_s13, %s311_s14  }
  0x58 PF: > { %p3349_p1 = scmp.ge.s32.totalorder %s3922_s20, 1  ;;  %p327_p4 = scmp.lt.s32.totalorder %s3922_s20, 4 }
  0x5a   : > { %p328_p5 = pnand %p3349_p1, %p327_p4 }
  0x5c   : > { %331 = sbr.rel (%p328_p5) target bundleno = 1271 (0x4f7), region = 107 }
  0x63   : > { %s334_s8 = sand.u32 1, %s3906_s16   ;;  %p5001_p3 = scmp.ne.s32.totalorder %s5000_s26, 0 }
  0x64   : > { %s3350_s9 = sshll.u32 %s334_s8, 4  ;;  %s3351_s10 = sshll.u32 %s334_s8, 3 }
  0x65   : > { %s3352_s12 = sshll.u32 %s334_s8, 11  ;;  %s336_s15 = scalar_lea.vmem [#allocation2], %s3350_s9 }
  0x66   : > { %s4083_s30 = scalar_lea.vmem [#allocation3], %s3351_s10  ;;  %s348_s6 = scalar_lea.sflag [#allocation5], %s334_s8 }
  0x67   : > { %s4085_s24 = scalar_lea.vmem [#allocation4], %s3352_s12 }
  0x68   : > { %3893 = dma.done.wait (%p5001_p3), %s348_s6, 32768  }
  0x69   : > { %3895 = vsyncadd (%p5001_p3), %s348_s6, 4294934528  ;;  %s3353_s11 = sshll.u32 %s334_s8, 5  ;;  %s357_s13 = scalar_lea.sflag [#allocation7], %s334_s8 }
  0x6a   : > { %s4091_s14 = scalar_lea.vmem [#allocation6], %s3353_s11 }
  0x6b   : > { %3897 = dma.done.wait (%p5001_p3), %s357_s13, 512  }
  0x6c   : > { %3899 = vsyncadd (%p5001_p3), %s357_s13, 4294966784  ;;  %v415_v4 = vld [vmem:[%s336_s15] sm:$0xff]  ;;  %v416_v5 = vld [vmem:[%s336_s15 + $0x8] sm:$0xff]  ;;  %p405_p7 = scmp.lt.s32.totalorder %s3914_s18, 2  ;;  %vm3177_vm0 = vcmask 7168  }
  0x6d   : > { %417 = vadd.xlane.f32.xlu0 %v415_v4  ;;  %v441_v6 = vld [vmem:[%s4085_s24] sm:$0xff]  ;;  %v442_v8 = vld [vmem:[%s4085_s24 + $0x8] sm:$0xff] }
  0x6e   : > { %v457_v7 = vld [vmem:[%s4085_s24 + $0x80] sm:$0xff]  ;;  %v458_v10 = vld [vmem:[%s4085_s24 + $0x88] sm:$0xff]  ;;  %s5062_s18 = smov (!%p405_p7, %s3914_s18), 2 }
  0x6f   : > { %v3357_v9 = vcombine.high %v441_v6, %v457_v7  ;;  %v3356_v11 = vcombine.low %v441_v6, %v457_v7  ;;  %v473_v12 = vld [vmem:[%s4085_s24 + $0x100] sm:$0xff]  ;;  %v3359_v14 = vcombine.high %v442_v8, %v458_v10  ;;  %v3358_v15 = vcombine.low %v442_v8, %v458_v10  ;;  %v474_v17 = vld [vmem:[%s4085_s24 + $0x108] sm:$0xff]  ;;  %s3616_s26 = sshll.u32 %s5062_s18, 4 }
  0x70   : > { %v489_v13 = vld [vmem:[%s4085_s24 + $0x180] sm:$0xff]  ;;  %v490_v18 = vld [vmem:[%s4085_s24 + $0x188] sm:$0xff]  ;;  %s412_s25 = scalar_lea.vmem %s4977_s4, %s3616_s26 }
  0x71   : > { %419 = vadd.xlane.f32.xlu0 %v416_v5  ;;  %v3389_v16 = vcombine.high %v473_v12, %v489_v13  ;;  %v505_v19 = vld [vmem:[%s4085_s24 + $0x200] sm:$0xff]  ;;  %2145 = vmatprep.subr.bf16.mxu0 %v3357_v9  ;;  %v3391_v20 = vcombine.high %v474_v17, %v490_v18  ;;  %v506_v22 = vld [vmem:[%s4085_s24 + $0x208] sm:$0xff]  ;;  %v3388_v24 = vcombine.low %v473_v12, %v489_v13 }
  0x72   : > { %v521_v21 = vld [vmem:[%s4085_s24 + $0x280] sm:$0xff]  ;;  %v522_v23 = vld [vmem:[%s4085_s24 + $0x288] sm:$0xff]  ;;  %2188 = vmatprep.subr.bf16.mxu1 %v3359_v14  ;;  %2146 = vmatpush1.bf16.msra.mxu0 %v3356_v11  ;;  %v3390_v25 = vcombine.low %v474_v17, %v490_v18  ;;  %v443_v14 = vld [vmem:[%s4085_s24 + $0x10] sm:$0xff] }
  0x73   : > { %2189 = vmatpush1.bf16.msra.mxu1 %v3358_v15  ;;  %2147 = vmatprep.subr.bf16.mxu0 %v3389_v16  ;;  %v3421_v26 = vcombine.high %v505_v19, %v521_v21  ;;  %v3423_v27 = vcombine.high %v506_v22, %v522_v23  ;;  %v3420_v28 = vcombine.low %v505_v19, %v521_v21  ;;  %v537_v38 = vld [vmem:[%s4085_s24 + $0x300] sm:$0xff]  ;;  %v538_v40 = vld [vmem:[%s4085_s24 + $0x308] sm:$0xff]  ;;  %v459_v15 = vld [vmem:[%s4085_s24 + $0x90] sm:$0xff] }
  0x74   : > { %2190 = vmatprep.subr.bf16.mxu1 %v3391_v20  ;;  %v3422_v29 = vcombine.low %v506_v22, %v522_v23  ;;  %v553_v39 = vld [vmem:[%s4085_s24 + $0x380] sm:$0xff]  ;;  %v554_v42 = vld [vmem:[%s4085_s24 + $0x388] sm:$0xff]  ;;  %v444_v16 = vld [vmem:[%s4085_s24 + $0x18] sm:$0xff]  ;;  %v3361_v17 = vcombine.high %v443_v14, %v459_v15  ;;  %v3360_v19 = vcombine.low %v443_v14, %v459_v15  ;;  %v3928_v22 = vmov 0  }
  0x75   : > { %v3453_v41 = vcombine.high %v537_v38, %v553_v39  ;;  %v3455_v43 = vcombine.high %v538_v40, %v554_v42  ;;  %v3452_v44 = vcombine.low %v537_v38, %v553_v39  ;;  %v3454_v45 = vcombine.low %v538_v40, %v554_v42  ;;  %v569_v46 = vld [vmem:[%s4085_s24 + $0x400] sm:$0xff]  ;;  %v570_v48 = vld [vmem:[%s4085_s24 + $0x408] sm:$0xff]  ;;  %v460_v18 = vld [vmem:[%s4085_s24 + $0x98] sm:$0xff]  ;;  %2177 = vmatprep.mubr.bf16.mxu0 %v3928_v22 }
  0x76   : > { %2148 = vmatpush1.bf16.msra.mxu0 %v3388_v24  ;;  %v585_v47 = vld [vmem:[%s4085_s24 + $0x480] sm:$0xff]  ;;  %v586_v50 = vld [vmem:[%s4085_s24 + $0x488] sm:$0xff]  ;;  %v3362_v20 = vcombine.low %v444_v16, %v460_v18  ;;  %v3363_v21 = vcombine.high %v444_v16, %v460_v18  ;;  %2220 = vmatprep.mubr.bf16.mxu1 %v3928_v22  ;;  %v507_v42 = vld [vmem:[%s4085_s24 + $0x210] sm:$0xff] }
  0x77   : > { %2191 = vmatpush1.bf16.msra.mxu1 %v3390_v25  ;;  %2149 = vmatprep.subr.bf16.mxu0 %v3421_v26  ;;  %v3485_v49 = vcombine.high %v569_v46, %v585_v47  ;;  %v3487_v51 = vcombine.high %v570_v48, %v586_v50  ;;  %v3484_v52 = vcombine.low %v569_v46, %v585_v47  ;;  %v601_v54 = vld [vmem:[%s4085_s24 + $0x500] sm:$0xff]  ;;  %v602_v56 = vld [vmem:[%s4085_s24 + $0x508] sm:$0xff]  ;;  %v667_v16 = vld [vmem:[%s4085_s24 + $0x710] sm:$0xff] }
  0x78   : > { %2192 = vmatprep.subr.bf16.mxu1 %v3423_v27  ;;  %v3486_v53 = vcombine.low %v570_v48, %v586_v50  ;;  %v617_v55 = vld [vmem:[%s4085_s24 + $0x580] sm:$0xff]  ;;  %v618_v58 = vld [vmem:[%s4085_s24 + $0x588] sm:$0xff]  ;;  %v539_v48 = vld [vmem:[%s4085_s24 + $0x310] sm:$0xff] }
  0x79   : > { %v3517_v57 = vcombine.high %v601_v54, %v617_v55  ;;  %v3519_v59 = vcombine.high %v602_v56, %v618_v58  ;;  %v3516_v60 = vcombine.low %v601_v54, %v617_v55  ;;  %v3518_v61 = vcombine.low %v602_v56, %v618_v58  ;;  %v633_v62 = vld [vmem:[%s4085_s24 + $0x600] sm:$0xff]  ;;  %v634_v0 = vld [vmem:[%s4085_s24 + $0x608] sm:$0xff]  ;;  %v540_v50 = vld [vmem:[%s4085_s24 + $0x318] sm:$0xff] }
  0x7a   : > { %2150 = vmatpush1.bf16.msra.mxu0 %v3420_v28  ;;  %v649_v63 = vld [vmem:[%s4085_s24 + $0x680] sm:$0xff]  ;;  %v650_v2 = vld [vmem:[%s4085_s24 + $0x688] sm:$0xff]  ;;  %v571_v56 = vld [vmem:[%s4085_s24 + $0x410] sm:$0xff] }
  0x7b   : > { %2193 = vmatpush1.bf16.msra.mxu1 %v3422_v29  ;;  %2151 = vmatprep.subr.bf16.mxu0 %v3453_v41  ;;  %v3549_v1 = vcombine.high %v633_v62, %v649_v63  ;;  %v3551_v3 = vcombine.high %v634_v0, %v650_v2  ;;  %v665_v6 = vld [vmem:[%s4085_s24 + $0x700] sm:$0xff]  ;;  %v666_v8 = vld [vmem:[%s4085_s24 + $0x708] sm:$0xff]  ;;  %v572_v58 = vld [vmem:[%s4085_s24 + $0x418] sm:$0xff] }
  0x7c   : > { %2194 = vmatprep.subr.bf16.mxu1 %v3455_v43  ;;  %v681_v7 = vld [vmem:[%s4085_s24 + $0x780] sm:$0xff]  ;;  %v682_v10 = vld [vmem:[%s4085_s24 + $0x788] sm:$0xff]  ;;  %v523_v43 = vld [vmem:[%s4085_s24 + $0x290] sm:$0xff] }
  0x7d   : > { %v3581_v9 = vcombine.high %v665_v6, %v681_v7  ;;  %v3583_v11 = vcombine.high %v666_v8, %v682_v10  ;;  %v3580_v12 = vcombine.low %v665_v6, %v681_v7  ;;  %v3582_v13 = vcombine.low %v666_v8, %v682_v10  ;;  %v635_v8 = vld [vmem:[%s4085_s24 + $0x610] sm:$0xff]  ;;  %v636_v10 = vld [vmem:[%s4085_s24 + $0x618] sm:$0xff] }
  0x7e   : > { %2152 = vmatpush1.bf16.msra.mxu0 %v3452_v44  ;;  %v508_v44 = vld [vmem:[%s4085_s24 + $0x218] sm:$0xff]  ;;  %v3425_v46 = vcombine.high %v507_v42, %v523_v43 }
  0x7f   : > { %2195 = vmatpush1.bf16.msra.mxu1 %v3454_v45  ;;  %2153 = vmatprep.subr.bf16.mxu0 %v3485_v49  ;;  %v524_v45 = vld [vmem:[%s4085_s24 + $0x298] sm:$0xff]  ;;  %v555_v49 = vld [vmem:[%s4085_s24 + $0x390] sm:$0xff] }
  0x80   : > { %2196 = vmatprep.subr.bf16.mxu1 %v3487_v51  ;;  %v3427_v47 = vcombine.high %v508_v44, %v524_v45  ;;  %v556_v51 = vld [vmem:[%s4085_s24 + $0x398] sm:$0xff]  ;;  %v3457_v54 = vcombine.high %v539_v48, %v555_v49 }
  0x81   : > { %v3459_v55 = vcombine.high %v540_v50, %v556_v51  ;;  %v668_v18 = vld [vmem:[%s4085_s24 + $0x718] sm:$0xff] }
  0x82   : > { %2154 = vmatpush1.bf16.msra.mxu0 %v3484_v52  ;;  %v3424_v52 = vcombine.low %v507_v42, %v523_v43 }
  0x83   : > { %2197 = vmatpush1.bf16.msra.mxu1 %v3486_v53  ;;  %2155 = vmatprep.subr.bf16.mxu0 %v3517_v57  ;;  %v3426_v53 = vcombine.low %v508_v44, %v524_v45  ;;  %v587_v57 = vld [vmem:[%s4085_s24 + $0x490] sm:$0xff]  ;;  %v509_v44 = vld [vmem:[%s4085_s24 + $0x220] sm:$0xff] }
  0x84   : > { %2198 = vmatprep.subr.bf16.mxu1 %v3519_v59  ;;  %v588_v59 = vld [vmem:[%s4085_s24 + $0x498] sm:$0xff]  ;;  %v525_v45 = vld [vmem:[%s4085_s24 + $0x2a0] sm:$0xff] }
  0x86   : > { %2156 = vmatpush1.bf16.msra.mxu0 %v3516_v60  ;;  %v3456_v60 = vcombine.low %v539_v48, %v555_v49  ;;  %v3429_v48 = vcombine.high %v509_v44, %v525_v45 }
  0x87   : > { %2199 = vmatpush1.bf16.msra.mxu1 %v3518_v61  ;;  %2157 = vmatprep.subr.bf16.mxu0 %v3549_v1  ;;  %v3458_v61 = vcombine.low %v540_v50, %v556_v51  ;;  %v619_v1 = vld [vmem:[%s4085_s24 + $0x590] sm:$0xff]  ;;  %v541_v50 = vld [vmem:[%s4085_s24 + $0x320] sm:$0xff] }
  0x88   : > { %2200 = vmatprep.subr.bf16.mxu1 %v3551_v3  ;;  %v620_v3 = vld [vmem:[%s4085_s24 + $0x598] sm:$0xff]  ;;  %v557_v51 = vld [vmem:[%s4085_s24 + $0x3a0] sm:$0xff] }
  0xfa   : > { %v418_v30 = vpop.xlane.xlu0 %417 }
  0xfb   : > { %v422_v31 = vmul.f32 0.0078125, %v418_v30  ;;  %v475_v30 = vld [vmem:[%s4085_s24 + $0x110] sm:$0xff] }
  0xfd   : > { %v4109_v32 = vsub.f32 %v415_v4, %v422_v31  ;;  %v3548_v4 = vcombine.low %v633_v62, %v649_v63  ;;  %v3489_v62 = vcombine.high %v571_v56, %v587_v57  ;;  %v3491_v63 = vcombine.high %v572_v58, %v588_v59 }
  0xfe   : > { %v420_v33 = vpop.xlane.xlu0 %419 }
  0xff   : > { %v423_v34 = vmul.f32 0.0078125, %v420_v33  ;;  %v426_v35 = vmul.f32 %v4109_v32, %v4109_v32  ;;  %2158 = vmatpush1.bf16.msra.mxu0 %v3548_v4  ;;  %v491_v33 = vld [vmem:[%s4085_s24 + $0x190] sm:$0xff]  ;;  %v3488_v4 = vcombine.low %v571_v56, %v587_v57  ;;  %v3461_v56 = vcombine.high %v541_v50, %v557_v51 }
 0x100   : > { %2159 = vmatprep.subr.bf16.mxu0 %v3581_v9  ;;  %v3393_v40 = vcombine.high %v475_v30, %v491_v33  ;;  %v651_v9 = vld [vmem:[%s4085_s24 + $0x690] sm:$0xff] }
 0x101   : > { %v4113_v36 = vsub.f32 %v416_v5, %v423_v34  ;;  %428 = vadd.xlane.f32.xlu1 %v426_v35  ;;  %v3550_v5 = vcombine.low %v634_v0, %v650_v2  ;;  %v476_v34 = vld [vmem:[%s4085_s24 + $0x118] sm:$0xff]  ;;  %v603_v0 = vld [vmem:[%s4085_s24 + $0x510] sm:$0xff]  ;;  %v3553_v14 = vcombine.high %v635_v8, %v651_v9 }
 0x102   : > { %v492_v35 = vld [vmem:[%s4085_s24 + $0x198] sm:$0xff]  ;;  %v3521_v6 = vcombine.high %v603_v0, %v619_v1 }
 0x103   : > { %v427_v37 = vmul.f32 %v4113_v36, %v4113_v36  ;;  %2201 = vmatpush1.bf16.msra.mxu1 %v3550_v5  ;;  %2160 = vmatpush1.bf16.msra.mxu0 %v3580_v12  ;;  %v3395_v41 = vcombine.high %v476_v34, %v492_v35  ;;  %v604_v2 = vld [vmem:[%s4085_s24 + $0x518] sm:$0xff]  ;;  %v3490_v5 = vcombine.low %v572_v58, %v588_v59  ;;  %v573_v58 = vld [vmem:[%s4085_s24 + $0x420] sm:$0xff] }
 0x104   : > { %2202 = vmatprep.subr.bf16.mxu1 %v3583_v11  ;;  %2231 = vmatprep.subr.bf16.mxu0 %v3361_v17  ;;  %v3523_v7 = vcombine.high %v604_v2, %v620_v3  ;;  %v652_v11 = vld [vmem:[%s4085_s24 + $0x698] sm:$0xff]  ;;  %v3520_v12 = vcombine.low %v603_v0, %v619_v1  ;;  %v683_v17 = vld [vmem:[%s4085_s24 + $0x790] sm:$0xff]  ;;  %v589_v59 = vld [vmem:[%s4085_s24 + $0x4a0] sm:$0xff] }
 0x105   : > { %430 = vadd.xlane.f32.xlu1 %v427_v37  ;;  %v3555_v15 = vcombine.high %v636_v10, %v652_v11  ;;  %v3493_v0 = vcombine.high %v573_v58, %v589_v59 }
 0x107   : > { %2203 = vmatpush1.bf16.msra.mxu1 %v3582_v13  ;;  %v3522_v13 = vcombine.low %v604_v2, %v620_v3  ;;  %v605_v2 = vld [vmem:[%s4085_s24 + $0x520] sm:$0xff] }
 0x108   : > { %2274 = vmatprep.subr.bf16.mxu1 %v3363_v21  ;;  %v3554_v21 = vcombine.low %v636_v10, %v652_v11  ;;  %v621_v3 = vld [vmem:[%s4085_s24 + $0x5a0] sm:$0xff] }
 0x109   : > { %v637_v10 = vld [vmem:[%s4085_s24 + $0x620] sm:$0xff] }
 0x10a   : > { %v653_v11 = vld [vmem:[%s4085_s24 + $0x6a0] sm:$0xff] }
 0x18e   : > { %v429_v23 = vpop.xlane.xlu1 %428 }
 0x18f   : > { %v432_v24 = vmul.f32 0.0078125, %v429_v23  ;;  %v3585_v23 = vcombine.high %v667_v16, %v683_v17 }
 0x191   : > { %v434_v25 = vadd.f32 1e-06, %v432_v24 }
 0x192   : > { %v431_v26 = vpop.xlane.xlu1 %430 }
 0x193   : > { %v433_v27 = vmul.f32 0.0078125, %v431_v26  ;;  %3676 = vrsqrt.f32 %v434_v25  ;;  %v445_v25 = vld [vmem:[%s4085_s24 + $0x20] sm:$0xff] }
 0x194   : > { %v461_v26 = vld [vmem:[%s4085_s24 + $0xa0] sm:$0xff] }
 0x195   : > { %v435_v28 = vadd.f32 1e-06, %v433_v27  ;;  %v446_v27 = vld [vmem:[%s4085_s24 + $0x28] sm:$0xff] }
 0x197   : > { %3678 = vrsqrt.f32 %v435_v28  ;;  %v462_v28 = vld [vmem:[%s4085_s24 + $0xa8] sm:$0xff] }
 0x19d   : > { %v3677_v29 = vpop.eup %3676 }
 0x19e   : > { %v438_v37 = vmul.f32 %v3677_v29, %v4109_v32  ;;  %v3392_v32 = vcombine.low %v475_v30, %v491_v33  ;;  %v3584_v29 = vcombine.low %v667_v16, %v683_v17  ;;  %v3367_v33 = vcombine.high %v446_v27, %v462_v28 }
 0x19f   : > { %v3557_v16 = vcombine.high %v637_v10, %v653_v11 }
 0x1a1   : > { %v3679_v31 = vpop.eup %3678 }
 0x1a2   : > { %v439_v38 = vmul.f32 %v3679_v31, %v4113_v36  ;;  %v3394_v36 = vcombine.low %v476_v34, %v492_v35  ;;  %v3365_v31 = vcombine.high %v445_v25, %v461_v26  ;;  %v477_v34 = vld [vmem:[%s4085_s24 + $0x120] sm:$0xff] }
 0x1a3   : > { %v493_v35 = vld [vmem:[%s4085_s24 + $0x1a0] sm:$0xff] }
 0x1a4   : > { %v4149_v39 = vpack.c.bf16 %v439_v38, %v438_v37  ;;  %v478_v37 = vld [vmem:[%s4085_s24 + $0x128] sm:$0xff]  ;;  %v3397_v42 = vcombine.high %v477_v34, %v493_v35 }
 0x1a5   : > { %v494_v38 = vld [vmem:[%s4085_s24 + $0x1a8] sm:$0xff] }
 0x1a6   : > { %5002 = vst [vmem:[#allocation10_spill] sm:$0xff] %v4149_v39  ;;  %2178 = vmatmul.mubr.bf16.vlgmr.msra.gmra.mrb[0].mxu0 %v4149_v39  ;;  %2221 = vmatmul.mubr.bf16.vlgmr.msra.gmra.mrb[0].mxu1 %v4149_v39  ;;  %v3399_v43 = vcombine.high %v478_v37, %v494_v38 }
 0x1a7   : > { %2232 = vmatpush1.bf16.msra.mxu0 %v3360_v19  ;;  %2275 = vmatpush1.bf16.msra.mxu1 %v3362_v20  ;;  %v684_v19 = vld [vmem:[%s4085_s24 + $0x798] sm:$0xff]  ;;  %v3552_v20 = vcombine.low %v635_v8, %v651_v9  ;;  %v3525_v8 = vcombine.high %v605_v2, %v621_v3 }
 0x1a8   : > { %2233 = vmatprep.subr.bf16.mxu0 %v3393_v40  ;;  %2276 = vmatprep.subr.bf16.mxu1 %v3395_v41  ;;  %v3587_v24 = vcombine.high %v668_v18, %v684_v19  ;;  %v3586_v30 = vcombine.low %v668_v18, %v684_v19  ;;  %v3364_v40 = vcombine.low %v445_v25, %v461_v26  ;;  %v669_v18 = vld [vmem:[%s4085_s24 + $0x720] sm:$0xff] }
 0x1a9   : > { %2263 = vmatprep.mubr.bf16.mxu0 %v3928_v22  ;;  %2306 = vmatprep.mubr.bf16.mxu1 %v3928_v22  ;;  %v3366_v41 = vcombine.low %v446_v27, %v462_v28  ;;  %v685_v19 = vld [vmem:[%s4085_s24 + $0x7a0] sm:$0xff]  ;;  %v447_v27 = vld [vmem:[%s4085_s24 + $0x30] sm:$0xff] }
 0x1aa   : > { %v3589_v25 = vcombine.high %v669_v18, %v685_v19  ;;  %v463_v28 = vld [vmem:[%s4085_s24 + $0xb0] sm:$0xff] }
 0x1ab   : > { %2234 = vmatpush1.bf16.msra.mxu0 %v3392_v32  ;;  %2277 = vmatpush1.bf16.msra.mxu1 %v3394_v36  ;;  %v510_v32 = vld [vmem:[%s4085_s24 + $0x228] sm:$0xff] }
 0x1ac   : > { %2235 = vmatprep.subr.bf16.mxu0 %v3425_v46  ;;  %2278 = vmatprep.subr.bf16.mxu1 %v3427_v47  ;;  %v526_v36 = vld [vmem:[%s4085_s24 + $0x2a8] sm:$0xff]  ;;  %v3396_v46 = vcombine.low %v477_v34, %v493_v35  ;;  %v3398_v47 = vcombine.low %v478_v37, %v494_v38  ;;  %v3369_v34 = vcombine.high %v447_v27, %v463_v28  ;;  %v479_v37 = vld [vmem:[%s4085_s24 + $0x130] sm:$0xff] }
 0x1ad   : > { %v3431_v49 = vcombine.high %v510_v32, %v526_v36  ;;  %v495_v38 = vld [vmem:[%s4085_s24 + $0x1b0] sm:$0xff] }
 0x1af   : > { %2236 = vmatpush1.bf16.msra.mxu0 %v3424_v52  ;;  %2279 = vmatpush1.bf16.msra.mxu1 %v3426_v53  ;;  %v542_v52 = vld [vmem:[%s4085_s24 + $0x328] sm:$0xff] }
 0x1b0   : > { %2237 = vmatprep.subr.bf16.mxu0 %v3457_v54  ;;  %2280 = vmatprep.subr.bf16.mxu1 %v3459_v55  ;;  %v558_v53 = vld [vmem:[%s4085_s24 + $0x3a8] sm:$0xff]  ;;  %v3428_v54 = vcombine.low %v509_v44, %v525_v45  ;;  %v3430_v55 = vcombine.low %v510_v32, %v526_v36  ;;  %v3401_v44 = vcombine.high %v479_v37, %v495_v38  ;;  %v511_v32 = vld [vmem:[%s4085_s24 + $0x230] sm:$0xff] }
 0x1b1   : > { %v3463_v57 = vcombine.high %v542_v52, %v558_v53  ;;  %v527_v36 = vld [vmem:[%s4085_s24 + $0x2b0] sm:$0xff] }
 0x1b3   : > { %2238 = vmatpush1.bf16.msra.mxu0 %v3456_v60  ;;  %2281 = vmatpush1.bf16.msra.mxu1 %v3458_v61  ;;  %v574_v60 = vld [vmem:[%s4085_s24 + $0x428] sm:$0xff] }
 0x1b4   : > { %2239 = vmatprep.subr.bf16.mxu0 %v3489_v62  ;;  %2282 = vmatprep.subr.bf16.mxu1 %v3491_v63  ;;  %v590_v61 = vld [vmem:[%s4085_s24 + $0x4a8] sm:$0xff]  ;;  %v3460_v62 = vcombine.low %v541_v50, %v557_v51  ;;  %v3462_v63 = vcombine.low %v542_v52, %v558_v53  ;;  %v3433_v50 = vcombine.high %v511_v32, %v527_v36  ;;  %v543_v52 = vld [vmem:[%s4085_s24 + $0x330] sm:$0xff] }
 0x1b5   : > { %v3495_v1 = vcombine.high %v574_v60, %v590_v61  ;;  %v559_v53 = vld [vmem:[%s4085_s24 + $0x3b0] sm:$0xff] }
 0x1b7   : > { %2240 = vmatpush1.bf16.msra.mxu0 %v3488_v4  ;;  %2283 = vmatpush1.bf16.msra.mxu1 %v3490_v5  ;;  %v606_v4 = vld [vmem:[%s4085_s24 + $0x528] sm:$0xff] }
 0x1b8   : > { %2241 = vmatprep.subr.bf16.mxu0 %v3521_v6  ;;  %2284 = vmatprep.subr.bf16.mxu1 %v3523_v7  ;;  %v622_v5 = vld [vmem:[%s4085_s24 + $0x5a8] sm:$0xff]  ;;  %v3492_v6 = vcombine.low %v573_v58, %v589_v59  ;;  %v3494_v7 = vcombine.low %v574_v60, %v590_v61  ;;  %v3465_v58 = vcombine.high %v543_v52, %v559_v53  ;;  %v575_v60 = vld [vmem:[%s4085_s24 + $0x430] sm:$0xff] }
 0x1b9   : > { %v3527_v9 = vcombine.high %v606_v4, %v622_v5  ;;  %v591_v61 = vld [vmem:[%s4085_s24 + $0x4b0] sm:$0xff] }
 0x1bb   : > { %2242 = vmatpush1.bf16.msra.mxu0 %v3520_v12  ;;  %2285 = vmatpush1.bf16.msra.mxu1 %v3522_v13  ;;  %v638_v12 = vld [vmem:[%s4085_s24 + $0x628] sm:$0xff] }
 0x1bc   : > { %2243 = vmatprep.subr.bf16.mxu0 %v3553_v14  ;;  %2286 = vmatprep.subr.bf16.mxu1 %v3555_v15  ;;  %v654_v13 = vld [vmem:[%s4085_s24 + $0x6a8] sm:$0xff]  ;;  %v3524_v14 = vcombine.low %v605_v2, %v621_v3  ;;  %v3526_v15 = vcombine.low %v606_v4, %v622_v5  ;;  %v3497_v2 = vcombine.high %v575_v60, %v591_v61  ;;  %v607_v4 = vld [vmem:[%s4085_s24 + $0x530] sm:$0xff] }
 0x1bd   : > { %v3559_v17 = vcombine.high %v638_v12, %v654_v13  ;;  %v623_v5 = vld [vmem:[%s4085_s24 + $0x5b0] sm:$0xff] }
 0x1bf   : > { %2244 = vmatpush1.bf16.msra.mxu0 %v3552_v20  ;;  %2287 = vmatpush1.bf16.msra.mxu1 %v3554_v21  ;;  %v670_v20 = vld [vmem:[%s4085_s24 + $0x728] sm:$0xff] }
 0x1c0   : > { %2245 = vmatprep.subr.bf16.mxu0 %v3585_v23  ;;  %2288 = vmatprep.subr.bf16.mxu1 %v3587_v24  ;;  %v686_v21 = vld [vmem:[%s4085_s24 + $0x7a8] sm:$0xff]  ;;  %v3556_v23 = vcombine.low %v637_v10, %v653_v11  ;;  %v3558_v24 = vcombine.low %v638_v12, %v654_v13  ;;  %v3529_v10 = vcombine.high %v607_v4, %v623_v5  ;;  %v639_v12 = vld [vmem:[%s4085_s24 + $0x630] sm:$0xff] }
 0x1c1   : > { %v3591_v26 = vcombine.high %v670_v20, %v686_v21  ;;  %v655_v13 = vld [vmem:[%s4085_s24 + $0x6b0] sm:$0xff] }
 0x1c3   : > { %2246 = vmatpush1.bf16.msra.mxu0 %v3584_v29  ;;  %2289 = vmatpush1.bf16.msra.mxu1 %v3586_v30  ;;  %v448_v29 = vld [vmem:[%s4085_s24 + $0x38] sm:$0xff] }
 0x1c4   : > { %2317 = vmatprep.subr.bf16.mxu0 %v3365_v31  ;;  %2360 = vmatprep.subr.bf16.mxu1 %v3367_v33  ;;  %v464_v30 = vld [vmem:[%s4085_s24 + $0xb8] sm:$0xff]  ;;  %v3588_v31 = vcombine.low %v669_v18, %v685_v19  ;;  %v3590_v33 = vcombine.low %v670_v20, %v686_v21  ;;  %v3561_v18 = vcombine.high %v639_v12, %v655_v13  ;;  %v671_v20 = vld [vmem:[%s4085_s24 + $0x730] sm:$0xff] }
 0x1c5   : > { %v3371_v35 = vcombine.high %v448_v29, %v464_v30  ;;  %v687_v21 = vld [vmem:[%s4085_s24 + $0x7b0] sm:$0xff] }
 0x1c6   : > { %2264 = vmatmul.mubr.bf16.vlgmr.msra.gmra.mrb[4].mxu0 %v4149_v39  ;;  %2307 = vmatmul.mubr.bf16.vlgmr.msra.gmra.mrb[4].mxu1 %v4149_v39 }
 0x1c7   : > { %2318 = vmatpush1.bf16.msra.mxu0 %v3364_v40  ;;  %2361 = vmatpush1.bf16.msra.mxu1 %v3366_v41  ;;  %v480_v40 = vld [vmem:[%s4085_s24 + $0x138] sm:$0xff] }
 0x1c8   : > { %2319 = vmatprep.subr.bf16.mxu0 %v3397_v42  ;;  %2362 = vmatprep.subr.bf16.mxu1 %v3399_v43  ;;  %v496_v41 = vld [vmem:[%s4085_s24 + $0x1b8] sm:$0xff]  ;;  %v3368_v42 = vcombine.low %v447_v27, %v463_v28  ;;  %v3370_v43 = vcombine.low %v448_v29, %v464_v30  ;;  %v3593_v27 = vcombine.high %v671_v20, %v687_v21  ;;  %v449_v29 = vld [vmem:[%s4085_s24 + $0x40] sm:$0xff] }
 0x1c9   : > { %2349 = vmatprep.mubr.bf16.mxu0 %v3928_v22  ;;  %2392 = vmatprep.mubr.bf16.mxu1 %v3928_v22  ;;  %v3403_v45 = vcombine.high %v480_v40, %v496_v41  ;;  %v465_v30 = vld [vmem:[%s4085_s24 + $0xc0] sm:$0xff] }
 0x1cb   : > { %2320 = vmatpush1.bf16.msra.mxu0 %v3396_v46  ;;  %2363 = vmatpush1.bf16.msra.mxu1 %v3398_v47  ;;  %v512_v46 = vld [vmem:[%s4085_s24 + $0x238] sm:$0xff] }
 0x1cc   : > { %2321 = vmatprep.subr.bf16.mxu0 %v3429_v48  ;;  %2364 = vmatprep.subr.bf16.mxu1 %v3431_v49  ;;  %v528_v47 = vld [vmem:[%s4085_s24 + $0x2b8] sm:$0xff]  ;;  %v3400_v48 = vcombine.low %v479_v37, %v495_v38  ;;  %v3402_v49 = vcombine.low %v480_v40, %v496_v41  ;;  %v3373_v37 = vcombine.high %v449_v29, %v465_v30  ;;  %v481_v40 = vld [vmem:[%s4085_s24 + $0x140] sm:$0xff] }
 0x1cd   : > { %v3435_v51 = vcombine.high %v512_v46, %v528_v47  ;;  %v497_v41 = vld [vmem:[%s4085_s24 + $0x1c0] sm:$0xff] }
 0x1cf   : > { %2322 = vmatpush1.bf16.msra.mxu0 %v3428_v54  ;;  %2365 = vmatpush1.bf16.msra.mxu1 %v3430_v55  ;;  %v544_v54 = vld [vmem:[%s4085_s24 + $0x338] sm:$0xff] }
 0x1d0   : > { %2323 = vmatprep.subr.bf16.mxu0 %v3461_v56  ;;  %2366 = vmatprep.subr.bf16.mxu1 %v3463_v57  ;;  %v560_v55 = vld [vmem:[%s4085_s24 + $0x3b8] sm:$0xff]  ;;  %v3432_v56 = vcombine.low %v511_v32, %v527_v36  ;;  %v3434_v57 = vcombine.low %v512_v46, %v528_v47  ;;  %v3405_v32 = vcombine.high %v481_v40, %v497_v41  ;;  %v513_v46 = vld [vmem:[%s4085_s24 + $0x240] sm:$0xff] }
 0x1d1   : > { %v3467_v59 = vcombine.high %v544_v54, %v560_v55  ;;  %v529_v47 = vld [vmem:[%s4085_s24 + $0x2c0] sm:$0xff] }
 0x1d3   : > { %2324 = vmatpush1.bf16.msra.mxu0 %v3460_v62  ;;  %2367 = vmatpush1.bf16.msra.mxu1 %v3462_v63  ;;  %v576_v62 = vld [vmem:[%s4085_s24 + $0x438] sm:$0xff] }
 0x1d4   : > { %2325 = vmatprep.subr.bf16.mxu0 %v3493_v0  ;;  %2368 = vmatprep.subr.bf16.mxu1 %v3495_v1  ;;  %v592_v63 = vld [vmem:[%s4085_s24 + $0x4b8] sm:$0xff]  ;;  %v3464_v0 = vcombine.low %v543_v52, %v559_v53  ;;  %v3466_v1 = vcombine.low %v544_v54, %v560_v55  ;;  %v3437_v52 = vcombine.high %v513_v46, %v529_v47  ;;  %v545_v54 = vld [vmem:[%s4085_s24 + $0x340] sm:$0xff] }
 0x1d5   : > { %v3499_v3 = vcombine.high %v576_v62, %v592_v63  ;;  %v561_v55 = vld [vmem:[%s4085_s24 + $0x3c0] sm:$0xff] }
 0x1d7   : > { %2326 = vmatpush1.bf16.msra.mxu0 %v3492_v6  ;;  %2369 = vmatpush1.bf16.msra.mxu1 %v3494_v7  ;;  %v608_v6 = vld [vmem:[%s4085_s24 + $0x538] sm:$0xff] }
 0x1d8   : > { %2327 = vmatprep.subr.bf16.mxu0 %v3525_v8  ;;  %2370 = vmatprep.subr.bf16.mxu1 %v3527_v9  ;;  %v624_v7 = vld [vmem:[%s4085_s24 + $0x5b8] sm:$0xff]  ;;  %v3496_v8 = vcombine.low %v575_v60, %v591_v61  ;;  %v3498_v9 = vcombine.low %v576_v62, %v592_v63  ;;  %v3469_v60 = vcombine.high %v545_v54, %v561_v55  ;;  %v577_v62 = vld [vmem:[%s4085_s24 + $0x440] sm:$0xff] }
 0x1d9   : > { %v3531_v11 = vcombine.high %v608_v6, %v624_v7  ;;  %v593_v63 = vld [vmem:[%s4085_s24 + $0x4c0] sm:$0xff] }
 0x1db   : > { %2328 = vmatpush1.bf16.msra.mxu0 %v3524_v14  ;;  %2371 = vmatpush1.bf16.msra.mxu1 %v3526_v15  ;;  %v640_v14 = vld [vmem:[%s4085_s24 + $0x638] sm:$0xff] }
 0x1dc   : > { %2329 = vmatprep.subr.bf16.mxu0 %v3557_v16  ;;  %2372 = vmatprep.subr.bf16.mxu1 %v3559_v17  ;;  %v656_v15 = vld [vmem:[%s4085_s24 + $0x6b8] sm:$0xff]  ;;  %v3528_v16 = vcombine.low %v607_v4, %v623_v5  ;;  %v3530_v17 = vcombine.low %v608_v6, %v624_v7  ;;  %v3501_v4 = vcombine.high %v577_v62, %v593_v63  ;;  %v609_v6 = vld [vmem:[%s4085_s24 + $0x540] sm:$0xff] }
 0x1dd   : > { %v3563_v19 = vcombine.high %v640_v14, %v656_v15  ;;  %v625_v7 = vld [vmem:[%s4085_s24 + $0x5c0] sm:$0xff] }
 0x1df   : > { %2330 = vmatpush1.bf16.msra.mxu0 %v3556_v23  ;;  %2373 = vmatpush1.bf16.msra.mxu1 %v3558_v24  ;;  %v672_v23 = vld [vmem:[%s4085_s24 + $0x738] sm:$0xff] }
 0x1e0   : > { %2331 = vmatprep.subr.bf16.mxu0 %v3589_v25  ;;  %2374 = vmatprep.subr.bf16.mxu1 %v3591_v26  ;;  %v688_v24 = vld [vmem:[%s4085_s24 + $0x7b8] sm:$0xff]  ;;  %v3560_v25 = vcombine.low %v639_v12, %v655_v13  ;;  %v3562_v26 = vcombine.low %v640_v14, %v656_v15  ;;  %v3533_v12 = vcombine.high %v609_v6, %v625_v7  ;;  %v641_v14 = vld [vmem:[%s4085_s24 + $0x640] sm:$0xff] }
 0x1e1   : > { %v3595_v28 = vcombine.high %v672_v23, %v688_v24  ;;  %v657_v15 = vld [vmem:[%s4085_s24 + $0x6c0] sm:$0xff] }
 0x1e3   : > { %2332 = vmatpush1.bf16.msra.mxu0 %v3588_v31  ;;  %2375 = vmatpush1.bf16.msra.mxu1 %v3590_v33  ;;  %v450_v31 = vld [vmem:[%s4085_s24 + $0x48] sm:$0xff] }
 0x1e4   : > { %2403 = vmatprep.subr.bf16.mxu0 %v3369_v34  ;;  %2446 = vmatprep.subr.bf16.mxu1 %v3371_v35  ;;  %v466_v33 = vld [vmem:[%s4085_s24 + $0xc8] sm:$0xff]  ;;  %v3592_v34 = vcombine.low %v671_v20, %v687_v21  ;;  %v3594_v35 = vcombine.low %v672_v23, %v688_v24  ;;  %v3565_v20 = vcombine.high %v641_v14, %v657_v15  ;;  %v673_v23 = vld [vmem:[%s4085_s24 + $0x740] sm:$0xff] }
 0x1e5   : > { %v3375_v38 = vcombine.high %v450_v31, %v466_v33  ;;  %v689_v24 = vld [vmem:[%s4085_s24 + $0x7c0] sm:$0xff] }
 0x1e6   : > { %2350 = vmatmul.mubr.bf16.vlgmr.msra.gmra.mrb[8].mxu0 %v4149_v39  ;;  %2393 = vmatmul.mubr.bf16.vlgmr.msra.gmra.mrb[8].mxu1 %v4149_v39 }
 0x1e7   : > { %2404 = vmatpush1.bf16.msra.mxu0 %v3368_v42  ;;  %2447 = vmatpush1.bf16.msra.mxu1 %v3370_v43  ;;  %v482_v42 = vld [vmem:[%s4085_s24 + $0x148] sm:$0xff] }
 0x1e8   : > { %2405 = vmatprep.subr.bf16.mxu0 %v3401_v44  ;;  %2448 = vmatprep.subr.bf16.mxu1 %v3403_v45  ;;  %v498_v43 = vld [vmem:[%s4085_s24 + $0x1c8] sm:$0xff]  ;;  %v3372_v44 = vcombine.low %v449_v29, %v465_v30  ;;  %v3374_v45 = vcombine.low %v450_v31, %v466_v33  ;;  %v3597_v29 = vcombine.high %v673_v23, %v689_v24  ;;  %v451_v31 = vld [vmem:[%s4085_s24 + $0x50] sm:$0xff] }
 0x1e9   : > { %2435 = vmatprep.mubr.bf16.mxu0 %v3928_v22  ;;  %2478 = vmatprep.mubr.bf16.mxu1 %v3928_v22  ;;  %v3407_v36 = vcombine.high %v482_v42, %v498_v43  ;;  %v467_v33 = vld [vmem:[%s4085_s24 + $0xd0] sm:$0xff] }
 0x1eb   : > { %2406 = vmatpush1.bf16.msra.mxu0 %v3400_v48  ;;  %2449 = vmatpush1.bf16.msra.mxu1 %v3402_v49  ;;  %v514_v48 = vld [vmem:[%s4085_s24 + $0x248] sm:$0xff] }
 0x1ec   : > { %2407 = vmatprep.subr.bf16.mxu0 %v3433_v50  ;;  %2450 = vmatprep.subr.bf16.mxu1 %v3435_v51  ;;  %v530_v49 = vld [vmem:[%s4085_s24 + $0x2c8] sm:$0xff]  ;;  %v3404_v50 = vcombine.low %v481_v40, %v497_v41  ;;  %v3406_v51 = vcombine.low %v482_v42, %v498_v43  ;;  %v3377_v40 = vcombine.high %v451_v31, %v467_v33  ;;  %v483_v42 = vld [vmem:[%s4085_s24 + $0x150] sm:$0xff] }
 0x1ed   : > { %v3439_v53 = vcombine.high %v514_v48, %v530_v49  ;;  %v499_v43 = vld [vmem:[%s4085_s24 + $0x1d0] sm:$0xff] }
 0x1ef   : > { %2408 = vmatpush1.bf16.msra.mxu0 %v3432_v56  ;;  %2451 = vmatpush1.bf16.msra.mxu1 %v3434_v57  ;;  %v546_v56 = vld [vmem:[%s4085_s24 + $0x348] sm:$0xff] }
 0x1f0   : > { %2409 = vmatprep.subr.bf16.mxu0 %v3465_v58  ;;  %2452 = vmatprep.subr.bf16.mxu1 %v3467_v59  ;;  %v562_v57 = vld [vmem:[%s4085_s24 + $0x3c8] sm:$0xff]  ;;  %v3436_v58 = vcombine.low %v513_v46, %v529_v47  ;;  %v3438_v59 = vcombine.low %v514_v48, %v530_v49  ;;  %v3409_v46 = vcombine.high %v483_v42, %v499_v43  ;;  %v515_v48 = vld [vmem:[%s4085_s24 + $0x250] sm:$0xff] }
 0x1f1   : > { %v3471_v61 = vcombine.high %v546_v56, %v562_v57  ;;  %v531_v49 = vld [vmem:[%s4085_s24 + $0x2d0] sm:$0xff] }
 0x1f3   : > { %2410 = vmatpush1.bf16.msra.mxu0 %v3464_v0  ;;  %2453 = vmatpush1.bf16.msra.mxu1 %v3466_v1  ;;  %v578_v0 = vld [vmem:[%s4085_s24 + $0x448] sm:$0xff] }
 0x1f4   : > { %2411 = vmatprep.subr.bf16.mxu0 %v3497_v2  ;;  %2454 = vmatprep.subr.bf16.mxu1 %v3499_v3  ;;  %v594_v1 = vld [vmem:[%s4085_s24 + $0x4c8] sm:$0xff]  ;;  %v3468_v2 = vcombine.low %v545_v54, %v561_v55  ;;  %v3470_v3 = vcombine.low %v546_v56, %v562_v57  ;;  %v3441_v54 = vcombine.high %v515_v48, %v531_v49  ;;  %v547_v56 = vld [vmem:[%s4085_s24 + $0x350] sm:$0xff] }
 0x1f5   : > { %v3503_v5 = vcombine.high %v578_v0, %v594_v1  ;;  %v563_v57 = vld [vmem:[%s4085_s24 + $0x3d0] sm:$0xff] }
 0x1f7   : > { %2412 = vmatpush1.bf16.msra.mxu0 %v3496_v8  ;;  %2455 = vmatpush1.bf16.msra.mxu1 %v3498_v9  ;;  %v610_v8 = vld [vmem:[%s4085_s24 + $0x548] sm:$0xff] }
 0x1f8   : > { %2413 = vmatprep.subr.bf16.mxu0 %v3529_v10  ;;  %2456 = vmatprep.subr.bf16.mxu1 %v3531_v11  ;;  %v626_v9 = vld [vmem:[%s4085_s24 + $0x5c8] sm:$0xff]  ;;  %v3500_v10 = vcombine.low %v577_v62, %v593_v63  ;;  %v3502_v11 = vcombine.low %v578_v0, %v594_v1  ;;  %v3473_v62 = vcombine.high %v547_v56, %v563_v57  ;;  %v579_v0 = vld [vmem:[%s4085_s24 + $0x450] sm:$0xff] }
 0x1f9   : > { %v3535_v13 = vcombine.high %v610_v8, %v626_v9  ;;  %v595_v1 = vld [vmem:[%s4085_s24 + $0x4d0] sm:$0xff] }
 0x1fb   : > { %2414 = vmatpush1.bf16.msra.mxu0 %v3528_v16  ;;  %2457 = vmatpush1.bf16.msra.mxu1 %v3530_v17  ;;  %v642_v16 = vld [vmem:[%s4085_s24 + $0x648] sm:$0xff] }
 0x1fc   : > { %2415 = vmatprep.subr.bf16.mxu0 %v3561_v18  ;;  %2458 = vmatprep.subr.bf16.mxu1 %v3563_v19  ;;  %v658_v17 = vld [vmem:[%s4085_s24 + $0x6c8] sm:$0xff]  ;;  %v3532_v18 = vcombine.low %v609_v6, %v625_v7  ;;  %v3534_v19 = vcombine.low %v610_v8, %v626_v9  ;;  %v3505_v6 = vcombine.high %v579_v0, %v595_v1  ;;  %v611_v8 = vld [vmem:[%s4085_s24 + $0x550] sm:$0xff] }
 0x1fd   : > { %v3567_v21 = vcombine.high %v642_v16, %v658_v17  ;;  %v627_v9 = vld [vmem:[%s4085_s24 + $0x5d0] sm:$0xff] }
 0x1ff   : > { %2416 = vmatpush1.bf16.msra.mxu0 %v3560_v25  ;;  %2459 = vmatpush1.bf16.msra.mxu1 %v3562_v26  ;;  %v674_v25 = vld [vmem:[%s4085_s24 + $0x748] sm:$0xff] }
 0x200   : > { %2417 = vmatprep.subr.bf16.mxu0 %v3593_v27  ;;  %2460 = vmatprep.subr.bf16.mxu1 %v3595_v28  ;;  %v690_v26 = vld [vmem:[%s4085_s24 + $0x7c8] sm:$0xff]  ;;  %v3564_v27 = vcombine.low %v641_v14, %v657_v15  ;;  %v3566_v28 = vcombine.low %v642_v16, %v658_v17  ;;  %v3537_v14 = vcombine.high %v611_v8, %v627_v9  ;;  %v643_v16 = vld [vmem:[%s4085_s24 + $0x650] sm:$0xff] }
 0x201   : > { %v3599_v30 = vcombine.high %v674_v25, %v690_v26  ;;  %v659_v17 = vld [vmem:[%s4085_s24 + $0x6d0] sm:$0xff] }
 0x203   : > { %2418 = vmatpush1.bf16.msra.mxu0 %v3592_v34  ;;  %2461 = vmatpush1.bf16.msra.mxu1 %v3594_v35  ;;  %v452_v34 = vld [vmem:[%s4085_s24 + $0x58] sm:$0xff] }
 0x204   : > { %2489 = vmatprep.subr.bf16.mxu0 %v3373_v37  ;;  %2532 = vmatprep.subr.bf16.mxu1 %v3375_v38  ;;  %v468_v35 = vld [vmem:[%s4085_s24 + $0xd8] sm:$0xff]  ;;  %v3596_v37 = vcombine.low %v673_v23, %v689_v24  ;;  %v3598_v38 = vcombine.low %v674_v25, %v690_v26  ;;  %v3569_v23 = vcombine.high %v643_v16, %v659_v17  ;;  %v675_v25 = vld [vmem:[%s4085_s24 + $0x750] sm:$0xff] }
 0x205   : > { %v3379_v41 = vcombine.high %v452_v34, %v468_v35  ;;  %v691_v26 = vld [vmem:[%s4085_s24 + $0x7d0] sm:$0xff] }
 0x206   : > { %2436 = vmatmul.mubr.bf16.vlgmr.msra.gmra.mrb[12].mxu0 %v4149_v39  ;;  %2479 = vmatmul.mubr.bf16.vlgmr.msra.gmra.mrb[12].mxu1 %v4149_v39 }
 0x207   : > { %2490 = vmatpush1.bf16.msra.mxu0 %v3372_v44  ;;  %2533 = vmatpush1.bf16.msra.mxu1 %v3374_v45  ;;  %v484_v44 = vld [vmem:[%s4085_s24 + $0x158] sm:$0xff] }
 0x208   : > { %2491 = vmatprep.subr.bf16.mxu0 %v3405_v32  ;;  %2534 = vmatprep.subr.bf16.mxu1 %v3407_v36  ;;  %v500_v45 = vld [vmem:[%s4085_s24 + $0x1d8] sm:$0xff]  ;;  %v3376_v32 = vcombine.low %v451_v31, %v467_v33  ;;  %v3378_v36 = vcombine.low %v452_v34, %v468_v35  ;;  %v3601_v31 = vcombine.high %v675_v25, %v691_v26  ;;  %v453_v34 = vld [vmem:[%s4085_s24 + $0x60] sm:$0xff] }
 0x209   : > { %2521 = vmatprep.mubr.bf16.mxu0 %v3928_v22  ;;  %2564 = vmatprep.mubr.bf16.mxu1 %v3928_v22  ;;  %v3411_v47 = vcombine.high %v484_v44, %v500_v45  ;;  %v469_v35 = vld [vmem:[%s4085_s24 + $0xe0] sm:$0xff] }
 0x20b   : > { %2492 = vmatpush1.bf16.msra.mxu0 %v3404_v50  ;;  %2535 = vmatpush1.bf16.msra.mxu1 %v3406_v51  ;;  %v516_v50 = vld [vmem:[%s4085_s24 + $0x258] sm:$0xff] }
 0x20c   : > { %2493 = vmatprep.subr.bf16.mxu0 %v3437_v52  ;;  %2536 = vmatprep.subr.bf16.mxu1 %v3439_v53  ;;  %v532_v51 = vld [vmem:[%s4085_s24 + $0x2d8] sm:$0xff]  ;;  %v3408_v52 = vcombine.low %v483_v42, %v499_v43  ;;  %v3410_v53 = vcombine.low %v484_v44, %v500_v45  ;;  %v3381_v42 = vcombine.high %v453_v34, %v469_v35  ;;  %v485_v44 = vld [vmem:[%s4085_s24 + $0x160] sm:$0xff] }
 0x20d   : > { %v3443_v55 = vcombine.high %v516_v50, %v532_v51  ;;  %v501_v45 = vld [vmem:[%s4085_s24 + $0x1e0] sm:$0xff] }
 0x20f   : > { %2494 = vmatpush1.bf16.msra.mxu0 %v3436_v58  ;;  %2537 = vmatpush1.bf16.msra.mxu1 %v3438_v59  ;;  %v548_v58 = vld [vmem:[%s4085_s24 + $0x358] sm:$0xff] }
 0x210   : > { %2495 = vmatprep.subr.bf16.mxu0 %v3469_v60  ;;  %2538 = vmatprep.subr.bf16.mxu1 %v3471_v61  ;;  %v564_v59 = vld [vmem:[%s4085_s24 + $0x3d8] sm:$0xff]  ;;  %v3440_v60 = vcombine.low %v515_v48, %v531_v49  ;;  %v3442_v61 = vcombine.low %v516_v50, %v532_v51  ;;  %v3413_v48 = vcombine.high %v485_v44, %v501_v45  ;;  %v517_v50 = vld [vmem:[%s4085_s24 + $0x260] sm:$0xff] }
 0x211   : > { %v3475_v63 = vcombine.high %v548_v58, %v564_v59  ;;  %v533_v51 = vld [vmem:[%s4085_s24 + $0x2e0] sm:$0xff] }
 0x213   : > { %2496 = vmatpush1.bf16.msra.mxu0 %v3468_v2  ;;  %2539 = vmatpush1.bf16.msra.mxu1 %v3470_v3  ;;  %v580_v2 = vld [vmem:[%s4085_s24 + $0x458] sm:$0xff] }
 0x214   : > { %2497 = vmatprep.subr.bf16.mxu0 %v3501_v4  ;;  %2540 = vmatprep.subr.bf16.mxu1 %v3503_v5  ;;  %v596_v3 = vld [vmem:[%s4085_s24 + $0x4d8] sm:$0xff]  ;;  %v3472_v4 = vcombine.low %v547_v56, %v563_v57  ;;  %v3474_v5 = vcombine.low %v548_v58, %v564_v59  ;;  %v3445_v56 = vcombine.high %v517_v50, %v533_v51  ;;  %v549_v58 = vld [vmem:[%s4085_s24 + $0x360] sm:$0xff] }
 0x215   : > { %v3507_v7 = vcombine.high %v580_v2, %v596_v3  ;;  %v565_v59 = vld [vmem:[%s4085_s24 + $0x3e0] sm:$0xff] }
 0x217   : > { %2498 = vmatpush1.bf16.msra.mxu0 %v3500_v10  ;;  %2541 = vmatpush1.bf16.msra.mxu1 %v3502_v11  ;;  %v612_v10 = vld [vmem:[%s4085_s24 + $0x558] sm:$0xff] }
 0x218   : > { %2499 = vmatprep.subr.bf16.mxu0 %v3533_v12  ;;  %2542 = vmatprep.subr.bf16.mxu1 %v3535_v13  ;;  %v628_v11 = vld [vmem:[%s4085_s24 + $0x5d8] sm:$0xff]  ;;  %v3504_v12 = vcombine.low %v579_v0, %v595_v1  ;;  %v3506_v13 = vcombine.low %v580_v2, %v596_v3  ;;  %v3477_v0 = vcombine.high %v549_v58, %v565_v59  ;;  %v581_v2 = vld [vmem:[%s4085_s24 + $0x460] sm:$0xff] }
 0x219   : > { %v3539_v15 = vcombine.high %v612_v10, %v628_v11  ;;  %v597_v3 = vld [vmem:[%s4085_s24 + $0x4e0] sm:$0xff] }
 0x21b   : > { %2500 = vmatpush1.bf16.msra.mxu0 %v3532_v18  ;;  %2543 = vmatpush1.bf16.msra.mxu1 %v3534_v19  ;;  %v644_v18 = vld [vmem:[%s4085_s24 + $0x658] sm:$0xff] }
 0x21c   : > { %2501 = vmatprep.subr.bf16.mxu0 %v3565_v20  ;;  %2544 = vmatprep.subr.bf16.mxu1 %v3567_v21  ;;  %v660_v19 = vld [vmem:[%s4085_s24 + $0x6d8] sm:$0xff]  ;;  %v3536_v20 = vcombine.low %v611_v8, %v627_v9  ;;  %v3538_v21 = vcombine.low %v612_v10, %v628_v11  ;;  %v3509_v8 = vcombine.high %v581_v2, %v597_v3  ;;  %v613_v10 = vld [vmem:[%s4085_s24 + $0x560] sm:$0xff] }
 0x21d   : > { %v3571_v24 = vcombine.high %v644_v18, %v660_v19  ;;  %v629_v11 = vld [vmem:[%s4085_s24 + $0x5e0] sm:$0xff] }
 0x21f   : > { %2502 = vmatpush1.bf16.msra.mxu0 %v3564_v27  ;;  %2545 = vmatpush1.bf16.msra.mxu1 %v3566_v28  ;;  %v676_v27 = vld [vmem:[%s4085_s24 + $0x758] sm:$0xff] }
 0x220   : > { %2503 = vmatprep.subr.bf16.mxu0 %v3597_v29  ;;  %2546 = vmatprep.subr.bf16.mxu1 %v3599_v30  ;;  %v692_v28 = vld [vmem:[%s4085_s24 + $0x7d8] sm:$0xff]  ;;  %v3568_v29 = vcombine.low %v643_v16, %v659_v17  ;;  %v3570_v30 = vcombine.low %v644_v18, %v660_v19  ;;  %v3541_v16 = vcombine.high %v613_v10, %v629_v11  ;;  %v645_v18 = vld [vmem:[%s4085_s24 + $0x660] sm:$0xff] }
 0x221   : > { %v3603_v33 = vcombine.high %v676_v27, %v692_v28  ;;  %v661_v19 = vld [vmem:[%s4085_s24 + $0x6e0] sm:$0xff] }
 0x223   : > { %2504 = vmatpush1.bf16.msra.mxu0 %v3596_v37  ;;  %2547 = vmatpush1.bf16.msra.mxu1 %v3598_v38  ;;  %v454_v37 = vld [vmem:[%s4085_s24 + $0x68] sm:$0xff] }
 0x224   : > { %2575 = vmatprep.subr.bf16.mxu0 %v3377_v40  ;;  %2618 = vmatprep.subr.bf16.mxu1 %v3379_v41  ;;  %v470_v38 = vld [vmem:[%s4085_s24 + $0xe8] sm:$0xff]  ;;  %v3600_v40 = vcombine.low %v675_v25, %v691_v26  ;;  %v3602_v41 = vcombine.low %v676_v27, %v692_v28  ;;  %v3573_v25 = vcombine.high %v645_v18, %v661_v19  ;;  %v677_v27 = vld [vmem:[%s4085_s24 + $0x760] sm:$0xff] }
 0x225   : > { %v3383_v43 = vcombine.high %v454_v37, %v470_v38  ;;  %v693_v28 = vld [vmem:[%s4085_s24 + $0x7e0] sm:$0xff] }
 0x226   : > { %2522 = vmatmul.mubr.bf16.vlgmr.msra.gmra.mrb[16].mxu0 %v4149_v39  ;;  %2565 = vmatmul.mubr.bf16.vlgmr.msra.gmra.mrb[16].mxu1 %v4149_v39 }
 0x227   : > { %2576 = vmatpush1.bf16.msra.mxu0 %v3376_v32  ;;  %2619 = vmatpush1.bf16.msra.mxu1 %v3378_v36  ;;  %v486_v32 = vld [vmem:[%s4085_s24 + $0x168] sm:$0xff] }
 0x228   : > { %2577 = vmatprep.subr.bf16.mxu0 %v3409_v46  ;;  %2620 = vmatprep.subr.bf16.mxu1 %v3411_v47  ;;  %v502_v36 = vld [vmem:[%s4085_s24 + $0x1e8] sm:$0xff]  ;;  %v3380_v46 = vcombine.low %v453_v34, %v469_v35  ;;  %v3382_v47 = vcombine.low %v454_v37, %v470_v38  ;;  %v3605_v34 = vcombine.high %v677_v27, %v693_v28  ;;  %v455_v37 = vld [vmem:[%s4085_s24 + $0x70] sm:$0xff] }
 0x229   : > { %2607 = vmatprep.mubr.bf16.mxu0 %v3928_v22  ;;  %2650 = vmatprep.mubr.bf16.mxu1 %v3928_v22  ;;  %v3415_v49 = vcombine.high %v486_v32, %v502_v36  ;;  %v471_v38 = vld [vmem:[%s4085_s24 + $0xf0] sm:$0xff] }
 0x22b   : > { %2578 = vmatpush1.bf16.msra.mxu0 %v3408_v52  ;;  %2621 = vmatpush1.bf16.msra.mxu1 %v3410_v53  ;;  %v518_v52 = vld [vmem:[%s4085_s24 + $0x268] sm:$0xff] }
 0x22c   : > { %2579 = vmatprep.subr.bf16.mxu0 %v3441_v54  ;;  %2622 = vmatprep.subr.bf16.mxu1 %v3443_v55  ;;  %v534_v53 = vld [vmem:[%s4085_s24 + $0x2e8] sm:$0xff]  ;;  %v3412_v54 = vcombine.low %v485_v44, %v501_v45  ;;  %v3414_v55 = vcombine.low %v486_v32, %v502_v36  ;;  %v3385_v44 = vcombine.high %v455_v37, %v471_v38  ;;  %v487_v32 = vld [vmem:[%s4085_s24 + $0x170] sm:$0xff] }
 0x22d   : > { %v3447_v57 = vcombine.high %v518_v52, %v534_v53  ;;  %v503_v36 = vld [vmem:[%s4085_s24 + $0x1f0] sm:$0xff] }
 0x22f   : > { %2580 = vmatpush1.bf16.msra.mxu0 %v3440_v60  ;;  %2623 = vmatpush1.bf16.msra.mxu1 %v3442_v61  ;;  %v550_v60 = vld [vmem:[%s4085_s24 + $0x368] sm:$0xff] }
 0x230   : > { %2581 = vmatprep.subr.bf16.mxu0 %v3473_v62  ;;  %2624 = vmatprep.subr.bf16.mxu1 %v3475_v63  ;;  %v566_v61 = vld [vmem:[%s4085_s24 + $0x3e8] sm:$0xff]  ;;  %v3444_v62 = vcombine.low %v517_v50, %v533_v51  ;;  %v3446_v63 = vcombine.low %v518_v52, %v534_v53  ;;  %v3417_v50 = vcombine.high %v487_v32, %v503_v36  ;;  %v519_v52 = vld [vmem:[%s4085_s24 + $0x270] sm:$0xff] }
 0x231   : > { %v3479_v1 = vcombine.high %v550_v60, %v566_v61  ;;  %v535_v53 = vld [vmem:[%s4085_s24 + $0x2f0] sm:$0xff] }
 0x233   : > { %2582 = vmatpush1.bf16.msra.mxu0 %v3472_v4  ;;  %2625 = vmatpush1.bf16.msra.mxu1 %v3474_v5  ;;  %v582_v4 = vld [vmem:[%s4085_s24 + $0x468] sm:$0xff] }
 0x234   : > { %2583 = vmatprep.subr.bf16.mxu0 %v3505_v6  ;;  %2626 = vmatprep.subr.bf16.mxu1 %v3507_v7  ;;  %v598_v5 = vld [vmem:[%s4085_s24 + $0x4e8] sm:$0xff]  ;;  %v3476_v6 = vcombine.low %v549_v58, %v565_v59  ;;  %v3478_v7 = vcombine.low %v550_v60, %v566_v61  ;;  %v3449_v58 = vcombine.high %v519_v52, %v535_v53  ;;  %v551_v60 = vld [vmem:[%s4085_s24 + $0x370] sm:$0xff] }
 0x235   : > { %v3511_v9 = vcombine.high %v582_v4, %v598_v5  ;;  %v567_v61 = vld [vmem:[%s4085_s24 + $0x3f0] sm:$0xff] }
 0x237   : > { %2584 = vmatpush1.bf16.msra.mxu0 %v3504_v12  ;;  %2627 = vmatpush1.bf16.msra.mxu1 %v3506_v13  ;;  %v614_v12 = vld [vmem:[%s4085_s24 + $0x568] sm:$0xff] }
 0x238   : > { %2585 = vmatprep.subr.bf16.mxu0 %v3537_v14  ;;  %2628 = vmatprep.subr.bf16.mxu1 %v3539_v15  ;;  %v630_v13 = vld [vmem:[%s4085_s24 + $0x5e8] sm:$0xff]  ;;  %v3508_v14 = vcombine.low %v581_v2, %v597_v3  ;;  %v3510_v15 = vcombine.low %v582_v4, %v598_v5  ;;  %v3481_v2 = vcombine.high %v551_v60, %v567_v61  ;;  %v583_v4 = vld [vmem:[%s4085_s24 + $0x470] sm:$0xff] }
 0x239   : > { %v3543_v17 = vcombine.high %v614_v12, %v630_v13  ;;  %v599_v5 = vld [vmem:[%s4085_s24 + $0x4f0] sm:$0xff] }
 0x23b   : > { %2586 = vmatpush1.bf16.msra.mxu0 %v3536_v20  ;;  %2629 = vmatpush1.bf16.msra.mxu1 %v3538_v21  ;;  %v646_v20 = vld [vmem:[%s4085_s24 + $0x668] sm:$0xff] }
 0x23c   : > { %2587 = vmatprep.subr.bf16.mxu0 %v3569_v23  ;;  %2630 = vmatprep.subr.bf16.mxu1 %v3571_v24  ;;  %v662_v21 = vld [vmem:[%s4085_s24 + $0x6e8] sm:$0xff]  ;;  %v3540_v23 = vcombine.low %v613_v10, %v629_v11  ;;  %v3542_v24 = vcombine.low %v614_v12, %v630_v13  ;;  %v615_v11 = vld [vmem:[%s4085_s24 + $0x570] sm:$0xff]  ;;  %v616_v13 = vld [vmem:[%s4085_s24 + $0x578] sm:$0xff] }
 0x23d   : > { %v3575_v26 = vcombine.high %v646_v20, %v662_v21  ;;  %v631_v12 = vld [vmem:[%s4085_s24 + $0x5f0] sm:$0xff] }
 0x23f   : > { %2588 = vmatpush1.bf16.msra.mxu0 %v3568_v29  ;;  %2631 = vmatpush1.bf16.msra.mxu1 %v3570_v30  ;;  %v678_v29 = vld [vmem:[%s4085_s24 + $0x768] sm:$0xff] }
 0x240   : > { %2589 = vmatprep.subr.bf16.mxu0 %v3601_v31  ;;  %2632 = vmatprep.subr.bf16.mxu1 %v3603_v33  ;;  %v694_v30 = vld [vmem:[%s4085_s24 + $0x7e8] sm:$0xff]  ;;  %v3572_v31 = vcombine.low %v645_v18, %v661_v19  ;;  %v3574_v33 = vcombine.low %v646_v20, %v662_v21  ;;  %v647_v19 = vld [vmem:[%s4085_s24 + $0x670] sm:$0xff]  ;;  %v648_v21 = vld [vmem:[%s4085_s24 + $0x678] sm:$0xff] }
 0x241   : > { %v3607_v35 = vcombine.high %v678_v29, %v694_v30  ;;  %v663_v20 = vld [vmem:[%s4085_s24 + $0x6f0] sm:$0xff] }
 0x243   : > { %2590 = vmatpush1.bf16.msra.mxu0 %v3600_v40  ;;  %2633 = vmatpush1.bf16.msra.mxu1 %v3602_v41  ;;  %v456_v40 = vld [vmem:[%s4085_s24 + $0x78] sm:$0xff] }
 0x244   : > { %2661 = vmatprep.subr.bf16.mxu0 %v3381_v42  ;;  %2704 = vmatprep.subr.bf16.mxu1 %v3383_v43  ;;  %v472_v41 = vld [vmem:[%s4085_s24 + $0xf8] sm:$0xff]  ;;  %v3604_v42 = vcombine.low %v677_v27, %v693_v28  ;;  %v3606_v43 = vcombine.low %v678_v29, %v694_v30  ;;  %v679_v28 = vld [vmem:[%s4085_s24 + $0x770] sm:$0xff] }
 0x245   : > { %v3387_v45 = vcombine.high %v456_v40, %v472_v41 }
 0x246   : > { %2608 = vmatmul.mubr.bf16.vlgmr.msra.gmra.mrb[20].mxu0 %v4149_v39  ;;  %2651 = vmatmul.mubr.bf16.vlgmr.msra.gmra.mrb[20].mxu1 %v4149_v39 }
 0x247   : > { %2662 = vmatpush1.bf16.msra.mxu0 %v3380_v46  ;;  %2705 = vmatpush1.bf16.msra.mxu1 %v3382_v47  ;;  %v488_v46 = vld [vmem:[%s4085_s24 + $0x178] sm:$0xff] }
 0x248   : > { %2663 = vmatprep.subr.bf16.mxu0 %v3413_v48  ;;  %2706 = vmatprep.subr.bf16.mxu1 %v3415_v49  ;;  %v504_v47 = vld [vmem:[%s4085_s24 + $0x1f8] sm:$0xff]  ;;  %v3384_v48 = vcombine.low %v455_v37, %v471_v38  ;;  %v3386_v49 = vcombine.low %v456_v40, %v472_v41  ;;  %v3576_v41 = vcombine.low %v647_v19, %v663_v20 }
 0x249   : > { %2693 = vmatprep.mubr.bf16.mxu0 %v3928_v22  ;;  %2736 = vmatprep.mubr.bf16.mxu1 %v3928_v22  ;;  %v3419_v51 = vcombine.high %v488_v46, %v504_v47 }
 0x24b   : > { %2664 = vmatpush1.bf16.msra.mxu0 %v3412_v54  ;;  %2707 = vmatpush1.bf16.msra.mxu1 %v3414_v55  ;;  %v520_v54 = vld [vmem:[%s4085_s24 + $0x278] sm:$0xff] }
 0x24c   : > { %2665 = vmatprep.subr.bf16.mxu0 %v3445_v56  ;;  %2708 = vmatprep.subr.bf16.mxu1 %v3447_v57  ;;  %v536_v55 = vld [vmem:[%s4085_s24 + $0x2f8] sm:$0xff]  ;;  %v3416_v56 = vcombine.low %v487_v32, %v503_v36  ;;  %v3418_v57 = vcombine.low %v488_v46, %v504_v47 }
 0x24d   : > { %v3451_v59 = vcombine.high %v520_v54, %v536_v55 }
 0x24f   : > { %2666 = vmatpush1.bf16.msra.mxu0 %v3444_v62  ;;  %2709 = vmatpush1.bf16.msra.mxu1 %v3446_v63  ;;  %v552_v62 = vld [vmem:[%s4085_s24 + $0x378] sm:$0xff] }
 0x250   : > { %2667 = vmatprep.subr.bf16.mxu0 %v3477_v0  ;;  %2710 = vmatprep.subr.bf16.mxu1 %v3479_v1  ;;  %v568_v63 = vld [vmem:[%s4085_s24 + $0x3f8] sm:$0xff]  ;;  %v3448_v0 = vcombine.low %v519_v52, %v535_v53  ;;  %v3450_v1 = vcombine.low %v520_v54, %v536_v55 }
 0x251   : > { %v3483_v3 = vcombine.high %v552_v62, %v568_v63 }
 0x253   : > { %2668 = vmatpush1.bf16.msra.mxu0 %v3476_v6  ;;  %2711 = vmatpush1.bf16.msra.mxu1 %v3478_v7  ;;  %v584_v6 = vld [vmem:[%s4085_s24 + $0x478] sm:$0xff] }
 0x254   : > { %2669 = vmatprep.subr.bf16.mxu0 %v3509_v8  ;;  %2712 = vmatprep.subr.bf16.mxu1 %v3511_v9  ;;  %v600_v7 = vld [vmem:[%s4085_s24 + $0x4f8] sm:$0xff]  ;;  %v3480_v8 = vcombine.low %v551_v60, %v567_v61  ;;  %v3513_v9 = vcombine.high %v583_v4, %v599_v5 }
 0x255   : > { %v3515_v10 = vcombine.high %v584_v6, %v600_v7 }
 0x257   : > { %2670 = vmatpush1.bf16.msra.mxu0 %v3508_v14  ;;  %2713 = vmatpush1.bf16.msra.mxu1 %v3510_v15  ;;  %v632_v14 = vld [vmem:[%s4085_s24 + $0x5f8] sm:$0xff]  ;;  %v3512_v15 = vcombine.low %v583_v4, %v599_v5 }
 0x258   : > { %2671 = vmatprep.subr.bf16.mxu0 %v3541_v16  ;;  %2714 = vmatprep.subr.bf16.mxu1 %v3543_v17  ;;  %v3514_v16 = vcombine.low %v584_v6, %v600_v7  ;;  %v3545_v17 = vcombine.high %v615_v11, %v631_v12  ;;  %v3547_v18 = vcombine.high %v616_v13, %v632_v14 }
 0x25b   : > { %2672 = vmatpush1.bf16.msra.mxu0 %v3540_v23  ;;  %2715 = vmatpush1.bf16.msra.mxu1 %v3542_v24  ;;  %v664_v23 = vld [vmem:[%s4085_s24 + $0x6f8] sm:$0xff]  ;;  %v3544_v24 = vcombine.low %v615_v11, %v631_v12 }
 0x25c   : > { %2673 = vmatprep.subr.bf16.mxu0 %v3573_v25  ;;  %2716 = vmatprep.subr.bf16.mxu1 %v3575_v26  ;;  %v3546_v25 = vcombine.low %v616_v13, %v632_v14  ;;  %v3577_v26 = vcombine.high %v647_v19, %v663_v20  ;;  %v3579_v27 = vcombine.high %v648_v21, %v664_v23 }
 0x25f   : > { %2674 = vmatpush1.bf16.msra.mxu0 %v3572_v31  ;;  %2717 = vmatpush1.bf16.msra.mxu1 %v3574_v33  ;;  %v695_v31 = vld [vmem:[%s4085_s24 + $0x7f0] sm:$0xff]  ;;  %v680_v33 = vld [vmem:[%s4085_s24 + $0x778] sm:$0xff] }
 0x260   : > { %2675 = vmatprep.subr.bf16.mxu0 %v3605_v34  ;;  %2718 = vmatprep.subr.bf16.mxu1 %v3607_v35  ;;  %v696_v34 = vld [vmem:[%s4085_s24 + $0x7f8] sm:$0xff]  ;;  %v3608_v36 = vcombine.low %v679_v28, %v695_v31 }
 0x261   : > { %v3611_v32 = vcombine.high %v680_v33, %v696_v34  ;;  %v3610_v46 = vcombine.low %v680_v33, %v696_v34 }
 0x263   : > { %2676 = vmatpush1.bf16.msra.mxu0 %v3604_v42  ;;  %2719 = vmatpush1.bf16.msra.mxu1 %v3606_v43  ;;  %v3578_v42 = vcombine.low %v648_v21, %v664_v23  ;;  %v705_v23 = vlaneseq }
 0x264   : > { %2747 = vmatprep.subr.bf16.mxu0 %v3385_v44  ;;  %2790 = vmatprep.subr.bf16.mxu1 %v3387_v45  ;;  %v3609_v45 = vcombine.high %v679_v28, %v695_v31 }
 0x266   : > { %2694 = vmatmul.mubr.bf16.vlgmr.msra.gmra.mrb[24].mxu0 %v4149_v39  ;;  %2737 = vmatmul.mubr.bf16.vlgmr.msra.gmra.mrb[24].mxu1 %v4149_v39 }
 0x267   : > { %2748 = vmatpush1.bf16.msra.mxu0 %v3384_v48  ;;  %2791 = vmatpush1.bf16.msra.mxu1 %v3386_v49 }
 0x268   : > { %2749 = vmatprep.subr.bf16.mxu0 %v3417_v50  ;;  %2792 = vmatprep.subr.bf16.mxu1 %v3419_v51 }
 0x269   : > { %2779 = vmatprep.mubr.bf16.mxu0 %v3928_v22  ;;  %2822 = vmatprep.mubr.bf16.mxu1 %v3928_v22  ;;  %v3482_v22 = vcombine.low %v552_v62, %v568_v63 }
 0x26b   : > { %2750 = vmatpush1.bf16.msra.mxu0 %v3416_v56  ;;  %2793 = vmatpush1.bf16.msra.mxu1 %v3418_v57 }
 0x26c   : > { %2751 = vmatprep.subr.bf16.mxu0 %v3449_v58  ;;  %2794 = vmatprep.subr.bf16.mxu1 %v3451_v59 }
 0x26f   : > { %2752 = vmatpush1.bf16.msra.mxu0 %v3448_v0  ;;  %2795 = vmatpush1.bf16.msra.mxu1 %v3450_v1 }
 0x270   : > { %2753 = vmatprep.subr.bf16.mxu0 %v3481_v2  ;;  %2796 = vmatprep.subr.bf16.mxu1 %v3483_v3 }
 0x273   : > { %2754 = vmatpush1.bf16.msra.mxu0 %v3480_v8  ;;  %2797 = vmatpush1.bf16.msra.mxu1 %v3482_v22 }
 0x274   : > { %2755 = vmatprep.subr.bf16.mxu0 %v3513_v9  ;;  %2798 = vmatprep.subr.bf16.mxu1 %v3515_v10 }
 0x277   : > { %2756 = vmatpush1.bf16.msra.mxu0 %v3512_v15  ;;  %2799 = vmatpush1.bf16.msra.mxu1 %v3514_v16 }
 0x278   : > { %2757 = vmatprep.subr.bf16.mxu0 %v3545_v17  ;;  %2800 = vmatprep.subr.bf16.mxu1 %v3547_v18 }
 0x279   : > { %v4392_v29 = vpop.f32.mrb[0].mxu0  ;;  %v4394_v30 = vpop.f32.mrb[0].mxu1 }
 0x27a   : > { %v4399_v35 = vpop.f32.mrb[1].mxu0  ;;  %v4401_v37 = vpop.f32.mrb[1].mxu1 }
 0x27b   : > { %2758 = vmatpush1.bf16.msra.mxu0 %v3544_v24  ;;  %2801 = vmatpush1.bf16.msra.mxu1 %v3546_v25  ;;  %v4403_v38 = vpop.f32.mrb[2].mxu0  ;;  %v4405_v40 = vpop.f32.mrb[2].mxu1  ;;  %v706_v24 = vshrl.u32 %v705_v23, 7 }
 0x27c   : > { %v4407_v43 = vpop.f32.mrb[3].mxu0  ;;  %v4409_v44 = vpop.f32.mrb[3].mxu1  ;;  %2759 = vmatprep.subr.bf16.mxu0 %v3577_v26  ;;  %2802 = vmatprep.subr.bf16.mxu1 %v3579_v27  ;;  %v697_v27 = vld [vmem:[%s4091_s14] sm:$0xff] }
 0x27d   : > { %v4493_v25 = vsub.s32 0, %v706_v24  ;;  %v4495_v26 = vsub.s32 2, %v706_v24  ;;  %v4498_v28 = vsub.s32 1, %v706_v24  ;;  %v4500_v31 = vsub.s32 3, %v706_v24 }
 0x27e   : > { %v4502_v33 = vsub.s32 4, %v706_v24  ;;  %v4504_v34 = vsub.s32 5, %v706_v24 }
 0x27f   : > { %2760 = vmatpush1.bf16.msra.mxu0 %v3576_v41  ;;  %2803 = vmatpush1.bf16.msra.mxu1 %v3578_v42  ;;  %v708_v41 = vrot.slane %v697_v27, %v4493_v25  ;;  %v716_v42 = vrot.slane %v697_v27, %v4495_v26 }
 0x280   : > { %2761 = vmatprep.subr.bf16.mxu0 %v3609_v45  ;;  %2804 = vmatprep.subr.bf16.mxu1 %v3611_v32  ;;  %v712_v45 = vrot.slane %v697_v27, %v4498_v28  ;;  %v720_v32 = vrot.slane %v697_v27, %v4500_v31 }
 0x281   : > { %v4513_v23 = vadd.f32 %v4392_v29, %v708_v41  ;;  %v4533_v29 = vadd.f32 %v4405_v40, %v716_v42 }
 0x283   : > { %2762 = vmatpush1.bf16.msra.mxu0 %v3608_v36  ;;  %2805 = vmatpush1.bf16.msra.mxu1 %v3610_v46  ;;  %v724_v36 = vrot.slane %v697_v27, %v4502_v33  ;;  %v728_v46 = vrot.slane %v697_v27, %v4504_v34  ;;  %5010 = vst [vmem:[#allocation18_spill] sm:$0xff] %v4513_v23  ;;  %5015 = vst [vmem:[#allocation23_spill] sm:$0xff] %v4533_v29 }
 0x286   : > { %2780 = vmatmul.mubr.bf16.vlgmr.msra.gmra.mrb[28].mxu0 %v4149_v39  ;;  %2823 = vmatmul.mubr.bf16.vlgmr.msra.gmra.mrb[28].mxu1 %v4149_v39  ;;  %v4516_v39 = vadd.f32 %v4394_v30, %v716_v42 }
 0x288   : > { %5011 = vst [vmem:[#allocation19_spill] sm:$0xff] %v4516_v39 }
 0x299   : > { %v4413_v47 = vpop.f32.mrb[4].mxu0  ;;  %v4415_v48 = vpop.f32.mrb[4].mxu1 }
 0x29a   : > { %v4417_v49 = vpop.f32.mrb[5].mxu0  ;;  %v4419_v50 = vpop.f32.mrb[5].mxu1  ;;  %v4536_v30 = vadd.f32 %v4413_v47, %v724_v36 }
 0x29b   : > { %v4421_v51 = vpop.f32.mrb[6].mxu0  ;;  %v4423_v52 = vpop.f32.mrb[6].mxu1 }
 0x29c   : > { %v4425_v53 = vpop.f32.mrb[7].mxu0  ;;  %v4427_v54 = vpop.f32.mrb[7].mxu1  ;;  %5016 = vst [vmem:[#allocation24_spill] sm:$0xff] %v4536_v30  ;;  %v4551_v40 = vadd.f32 %v4421_v51, %v724_v36 }
 0x29e   : > { %5020 = vst [vmem:[#allocation28_spill] sm:$0xff] %v4551_v40 }
 0x2b9   : > { %v4429_v55 = vpop.f32.mrb[8].mxu0  ;;  %v4431_v56 = vpop.f32.mrb[8].mxu1 }
 0x2ba   : > { %v4433_v57 = vpop.f32.mrb[9].mxu0  ;;  %v4435_v58 = vpop.f32.mrb[9].mxu1 }
 0x2bb   : > { %v4437_v59 = vpop.f32.mrb[10].mxu0  ;;  %v4439_v60 = vpop.f32.mrb[10].mxu1 }
 0x2bc   : > { %v4441_v61 = vpop.f32.mrb[11].mxu0  ;;  %v4443_v62 = vpop.f32.mrb[11].mxu1 }
 0x2d9   : > { %v4445_v63 = vpop.f32.mrb[12].mxu0  ;;  %v4447_v0 = vpop.f32.mrb[12].mxu1 }
 0x2da   : > { %v4449_v1 = vpop.f32.mrb[13].mxu0  ;;  %v4451_v2 = vpop.f32.mrb[13].mxu1 }
 0x2db   : > { %v4453_v3 = vpop.f32.mrb[14].mxu0  ;;  %v4455_v4 = vpop.f32.mrb[14].mxu1 }
 0x2dc   : > { %v4457_v5 = vpop.f32.mrb[15].mxu0  ;;  %v4459_v6 = vpop.f32.mrb[15].mxu1 }
 0x2f9   : > { %v4461_v7 = vpop.f32.mrb[16].mxu0  ;;  %v4463_v8 = vpop.f32.mrb[16].mxu1 }
 0x2fa   : > { %v4465_v22 = vpop.f32.mrb[17].mxu0  ;;  %v4467_v9 = vpop.f32.mrb[17].mxu1 }
 0x2fb   : > { %v4469_v10 = vpop.f32.mrb[18].mxu0  ;;  %v4471_v11 = vpop.f32.mrb[18].mxu1 }
 0x2fc   : > { %v4473_v12 = vpop.f32.mrb[19].mxu0  ;;  %v4475_v13 = vpop.f32.mrb[19].mxu1 }
 0x2fd   : > { %5003 = vst [vmem:[#allocation11_spill] sm:$0xff] %v4475_v13  ;;  %v4530_v13 = vadd.f32 %v4403_v38, %v708_v41 }
 0x2ff   : > { %5014 = vst [vmem:[#allocation22_spill] sm:$0xff] %v4530_v13  ;;  %v2866_v42 = vmax.f32 %v4530_v13, %v4533_v29 }
 0x319   : > { %v4477_v14 = vpop.f32.mrb[20].mxu0  ;;  %v4479_v15 = vpop.f32.mrb[20].mxu1 }
 0x31a   : > { %5004 = vst [vmem:[#allocation12_spill] sm:$0xff] %v4479_v15  ;;  %v4481_v16 = vpop.f32.mrb[21].mxu0  ;;  %v4483_v17 = vpop.f32.mrb[21].mxu1  ;;  %v4526_v15 = vsub.s32 7, %v706_v24 }
 0x31b   : > { %5005 = vst [vmem:[#allocation13_spill] sm:$0xff] %v4483_v17  ;;  %v4485_v18 = vpop.f32.mrb[22].mxu0  ;;  %v4487_v19 = vpop.f32.mrb[22].mxu1  ;;  %v4524_v17 = vadd.f32 %v4401_v37, %v720_v32  ;;  %v4545_v37 = vadd.f32 %v4417_v49, %v728_v46 }
 0x31c   : > { %5006 = vst [vmem:[#allocation14_spill] sm:$0xff] %v4485_v18  ;;  %5007 = vst [vmem:[#allocation15_spill] sm:$0xff] %v4487_v19  ;;  %v4489_v20 = vpop.f32.mrb[23].mxu0  ;;  %v4491_v21 = vpop.f32.mrb[23].mxu1  ;;  %v4521_v19 = vadd.f32 %v4399_v35, %v712_v45  ;;  %v4539_v18 = vadd.f32 %v4407_v43, %v712_v45  ;;  %v4542_v35 = vadd.f32 %v4409_v44, %v720_v32 }
 0x31d   : > { %5008 = vst [vmem:[#allocation16_spill] sm:$0xff] %v4489_v20  ;;  %5009 = vst [vmem:[#allocation17_spill] sm:$0xff] %v4491_v21  ;;  %v4518_v21 = vsub.s32 6, %v706_v24  ;;  %v698_v20 = vld [vmem:[%s4091_s14 + $0x8] sm:$0xff]  ;;  %v2833_v24 = vmax.f32 %v4513_v23, %v4516_v39  ;;  %v736_v41 = vrot.slane %v697_v27, %v4526_v15  ;;  %v4558_v44 = vadd.f32 %v4425_v53, %v728_v46 }
 0x31e   : > { %5012 = vst [vmem:[#allocation20_spill] sm:$0xff] %v4521_v19  ;;  %5013 = vst [vmem:[#allocation21_spill] sm:$0xff] %v4524_v17  ;;  %v740_v47 = vrot.slane %v698_v20, %v4493_v25  ;;  %v2834_v43 = vmax.f32 %v4521_v19, %v4524_v17  ;;  %v744_v49 = vrot.slane %v698_v20, %v4498_v28 }
 0x31f   : > { %5017 = vst [vmem:[#allocation25_spill] sm:$0xff] %v4539_v18  ;;  %5018 = vst [vmem:[#allocation26_spill] sm:$0xff] %v4542_v35  ;;  %v732_v38 = vrot.slane %v697_v27, %v4518_v21  ;;  %v2835_v45 = vmax.f32 %v2833_v24, %v4536_v30  ;;  %v2867_v51 = vmax.f32 %v4539_v18, %v4542_v35 }
 0x320   : > { %5019 = vst [vmem:[#allocation27_spill] sm:$0xff] %v4545_v37  ;;  %5021 = vst [vmem:[#allocation29_spill] sm:$0xff] %v4558_v44  ;;  %v2836_v32 = vmax.f32 %v2834_v43, %v4545_v37  ;;  %v2868_v53 = vmax.f32 %v2866_v42, %v4551_v40  ;;  %v4576_v46 = vadd.f32 %v4429_v55, %v740_v47 }
 0x321   : > { %v4572_v27 = vadd.f32 %v4415_v48, %v732_v38  ;;  %v748_v29 = vrot.slane %v698_v20, %v4495_v26  ;;  %v4584_v43 = vadd.f32 %v4419_v50, %v736_v41  ;;  %v2869_v35 = vmax.f32 %v2867_v51, %v4558_v44 }
 0x322   : > { %v4588_v18 = vadd.f32 %v4433_v57, %v744_v49  ;;  %v752_v48 = vrot.slane %v698_v20, %v4500_v31  ;;  %v4597_v37 = vadd.f32 %v4423_v52, %v732_v38  ;;  %v4600_v50 = vadd.f32 %v4437_v59, %v740_v47 }
 0x323   : > { %5022 = vst [vmem:[#allocation30_spill] sm:$0xff] %v4572_v27  ;;  %v2837_v40 = vmax.f32 %v2835_v45, %v4572_v27  ;;  %v756_v51 = vrot.slane %v698_v20, %v4502_v33  ;;  %v2838_v30 = vmax.f32 %v2836_v32, %v4584_v43  ;;  %v4609_v39 = vadd.f32 %v4427_v54, %v736_v41  ;;  %v699_v27 = vld [vmem:[%s4091_s14 + $0x10] sm:$0xff] }
 0x324   : > { %v4612_v19 = vadd.f32 %v4441_v61, %v744_v49  ;;  %v760_v52 = vrot.slane %v698_v20, %v4504_v34  ;;  %v2870_v38 = vmax.f32 %v2868_v53, %v4597_v37  ;;  %v4621_v23 = vadd.f32 %v4431_v56, %v748_v29 }
 0x325   : > { %v2839_v59 = vmax.f32 %v2837_v40, %v4576_v46  ;;  %v2871_v47 = vmax.f32 %v2869_v35, %v4609_v39  ;;  %v2840_v45 = vmax.f32 %v2838_v30, %v4588_v18  ;;  %v4625_v41 = vadd.f32 %v4445_v63, %v756_v51 }
 0x326   : > { %v2872_v54 = vmax.f32 %v2870_v38, %v4600_v50  ;;  %v764_v61 = vrot.slane %v698_v20, %v4518_v21  ;;  %v4629_v49 = vadd.f32 %v4435_v58, %v752_v48  ;;  %v4633_v35 = vadd.f32 %v4449_v1, %v760_v52 }
 0x327   : > { %v2873_v40 = vmax.f32 %v2871_v47, %v4612_v19  ;;  %v768_v30 = vrot.slane %v698_v20, %v4526_v15  ;;  %v2841_v56 = vmax.f32 %v2839_v59, %v4621_v23  ;;  %v4638_v32 = vadd.f32 %v4439_v60, %v748_v29 }
 0x328   : > { %v4641_v63 = vadd.f32 %v4453_v3, %v756_v51  ;;  %v772_v53 = vrot.slane %v699_v27, %v4493_v25  ;;  %v2842_v58 = vmax.f32 %v2840_v45, %v4629_v49  ;;  %v4646_v38 = vadd.f32 %v4443_v62, %v752_v48 }
 0x329   : > { %v4649_v1 = vadd.f32 %v4457_v5, %v760_v52  ;;  %v776_v20 = vrot.slane %v699_v27, %v4498_v28  ;;  %v2874_v59 = vmax.f32 %v2872_v54, %v4638_v32  ;;  %v2843_v60 = vmax.f32 %v2841_v56, %v4625_v41 }
 0x32a   : > { %v2875_v29 = vmax.f32 %v2873_v40, %v4646_v38  ;;  %v2844_v3 = vmax.f32 %v2842_v58, %v4633_v35  ;;  %v4657_v51 = vadd.f32 %v4447_v0, %v764_v61  ;;  %v4661_v62 = vadd.f32 %v4461_v7, %v772_v53 }
 0x32b   : > { %v2876_v47 = vmax.f32 %v2874_v59, %v4641_v63  ;;  %v780_v5 = vrot.slane %v699_v27, %v4495_v26  ;;  %v4665_v48 = vadd.f32 %v4451_v2, %v768_v30  ;;  %v4669_v45 = vadd.f32 %v4465_v22, %v776_v20 }
 0x32c   : > { %v2877_v52 = vmax.f32 %v2875_v29, %v4649_v1  ;;  %v784_v54 = vrot.slane %v699_v27, %v4500_v31  ;;  %v2845_v0 = vmax.f32 %v2843_v60, %v4657_v51  ;;  %v4674_v40 = vadd.f32 %v4455_v4, %v764_v61 }
 0x32d   : > { %v4677_v7 = vadd.f32 %v4469_v10, %v772_v53  ;;  %v788_v56 = vrot.slane %v699_v27, %v4502_v33  ;;  %v2846_v2 = vmax.f32 %v2844_v3, %v4665_v48  ;;  %v4682_v58 = vadd.f32 %v4459_v6, %v768_v30  ;;  %v700_v53 = vld [vmem:[%s4091_s14 + $0x18] sm:$0xff] }
 0x32e   : > { %v4685_v22 = vadd.f32 %v4473_v12, %v776_v20  ;;  %v792_v59 = vrot.slane %v699_v27, %v4504_v34  ;;  %v2878_v60 = vmax.f32 %v2876_v47, %v4674_v40  ;;  %v2847_v4 = vmax.f32 %v2845_v0, %v4661_v62 }
 0x32f   : > { %5023 = vst [vmem:[#allocation31_spill] sm:$0xff] %v4677_v7  ;;  %5024 = vst [vmem:[#allocation32_spill] sm:$0xff] %v4682_v58  ;;  %v2879_v61 = vmax.f32 %v2877_v52, %v4682_v58  ;;  %v2848_v10 = vmax.f32 %v2846_v2, %v4669_v45  ;;  %v4694_v29 = vadd.f32 %v4463_v8, %v780_v5  ;;  %v5025_v2 = vld [vmem:[#allocation14_spill] sm:$0xff] }
 0x330   : > { %v2880_v6 = vmax.f32 %v2878_v60, %v4677_v7  ;;  %v4698_v30 = vadd.f32 %v4477_v14, %v788_v56  ;;  %v796_v12 = vrot.slane %v699_v27, %v4518_v21  ;;  %v4702_v20 = vadd.f32 %v4467_v9, %v784_v54  ;;  %v5026_v7 = vld [vmem:[#allocation11_spill] sm:$0xff] }
 0x331   : > { %v2881_v3 = vmax.f32 %v2879_v61, %v4685_v22  ;;  %v4706_v47 = vadd.f32 %v4481_v16, %v792_v59  ;;  %v800_v52 = vrot.slane %v699_v27, %v4526_v15  ;;  %v2849_v8 = vmax.f32 %v2847_v4, %v4694_v29  ;;  %v5027_v61 = vld [vmem:[#allocation16_spill] sm:$0xff] }
 0x332   : > { %v4711_v0 = vadd.f32 %v4471_v11, %v780_v5  ;;  %v4714_v14 = vadd.f32 %v5025_v2, %v788_v56  ;;  %v804_v60 = vrot.slane %v700_v53, %v4493_v25  ;;  %v2850_v9 = vmax.f32 %v2848_v10, %v4702_v20  ;;  %v5028_v2 = vld [vmem:[#allocation12_spill] sm:$0xff] }
 0x333   : > { %v4719_v58 = vadd.f32 %v5026_v7, %v784_v54  ;;  %v4722_v16 = vadd.f32 %v5027_v61, %v792_v59  ;;  %v808_v27 = vrot.slane %v700_v53, %v4498_v28  ;;  %v2851_v11 = vmax.f32 %v2849_v8, %v4698_v30  ;;  %v5029_v7 = vld [vmem:[#allocation13_spill] sm:$0xff]  ;;  %v5030_v8 = vld [vmem:[#allocation15_spill] sm:$0xff] }
 0x334   : > { %v2882_v4 = vmax.f32 %v2880_v6, %v4711_v0  ;;  %v2852_v56 = vmax.f32 %v2850_v9, %v4706_v47  ;;  %v4730_v25 = vadd.f32 %v5028_v2, %v796_v12  ;;  %v4737_v59 = vadd.f32 %v5029_v7, %v800_v52  ;;  %v5032_v2 = vld [vmem:[#allocation17_spill] sm:$0xff] }
 0x335   : > { %v2883_v5 = vmax.f32 %v2881_v3, %v4719_v58  ;;  %v4745_v9 = vadd.f32 %v5030_v8, %v796_v12  ;;  %v812_v61 = vrot.slane %v700_v53, %v4495_v26  ;;  %v4753_v7 = vadd.f32 %v5032_v2, %v800_v52 }
 0x336   : > { %v2884_v10 = vmax.f32 %v2882_v4, %v4714_v14  ;;  %v2853_v3 = vmax.f32 %v2851_v11, %v4730_v25  ;;  %v820_v8 = vrot.slane %v700_v53, %v4502_v33 }
 0x337   : > { %v2885_v28 = vmax.f32 %v2883_v5, %v4722_v16  ;;  %v816_v5 = vrot.slane %v700_v53, %v4500_v31 }
 0x338   : > { %v2886_v11 = vmax.f32 %v2884_v10, %v4745_v9 }
 0x339   : > { %v4567_v36 = vpop.f32.mrb[24].mxu0  ;;  %v4569_v17 = vpop.f32.mrb[24].mxu1  ;;  %v2887_v26 = vmax.f32 %v2885_v28, %v4753_v7  ;;  %v832_v28 = vrot.slane %v700_v53, %v4526_v15 }
 0x33a   : > { %v4579_v24 = vpop.f32.mrb[25].mxu0  ;;  %v4581_v13 = vpop.f32.mrb[25].mxu1  ;;  %v4734_v54 = vadd.f32 %v4567_v36, %v804_v60  ;;  %v2854_v36 = vmax.f32 %v2852_v56, %v4737_v59  ;;  %v4766_v52 = vadd.f32 %v4569_v17, %v812_v61 }
 0x33b   : > { %v4591_v42 = vpop.f32.mrb[26].mxu0  ;;  %v4593_v55 = vpop.f32.mrb[26].mxu1  ;;  %v4741_v6 = vadd.f32 %v4579_v24, %v808_v27 }
 0x33c   : > { %v4603_v44 = vpop.f32.mrb[27].mxu0  ;;  %v4605_v57 = vpop.f32.mrb[27].mxu1  ;;  %v4749_v4 = vadd.f32 %v4591_v42, %v804_v60  ;;  %v2855_v12 = vmax.f32 %v2853_v3, %v4734_v54  ;;  %v824_v60 = vrot.slane %v700_v53, %v4504_v34  ;;  %v4777_v34 = vadd.f32 %v4593_v55, %v812_v61 }
 0x33d   : > { %v4757_v24 = vadd.f32 %v4603_v44, %v808_v27  ;;  %v2856_v42 = vmax.f32 %v2854_v36, %v4741_v6  ;;  %v828_v44 = vrot.slane %v700_v53, %v4518_v21  ;;  %v4771_v27 = vadd.f32 %v4581_v13, %v816_v5 }
 0x33e   : > { %5031 = vst [vmem:[#allocation14_spill] sm:$0xff] %v4749_v4  ;;  %v2888_v31 = vmax.f32 %v2886_v11, %v4749_v4  ;;  %v2857_v3 = vmax.f32 %v2855_v12, %v4766_v52  ;;  %5034 = vst [vmem:[#allocation16_spill] sm:$0xff] %v4777_v34  ;;  %v4783_v13 = vadd.f32 %v4605_v57, %v816_v5 }
 0x33f   : > { %5033 = vst [vmem:[#allocation11_spill] sm:$0xff] %v4757_v24  ;;  %v2889_v56 = vmax.f32 %v2887_v26, %v4757_v24  ;;  %v2858_v21 = vmax.f32 %v2856_v42, %v4771_v27 }
 0x340   : > { %v2890_v15 = vmax.f32 %v2888_v31, %v4777_v34 }
 0x341   : > { %v2891_v4 = vmax.f32 %v2889_v56, %v4783_v13 }
 0x359   : > { %v2781_v10 = vpop.f32.mrb[28].mxu0  ;;  %v2824_v33 = vpop.f32.mrb[28].mxu1 }
 0x35a   : > { %v4779_v17 = vadd.f32 %v2781_v10, %v820_v8  ;;  %v2783_v36 = vpop.f32.mrb[29].mxu0  ;;  %v2826_v2 = vpop.f32.mrb[29].mxu1  ;;  %v4789_v12 = vadd.f32 %v2824_v33, %v828_v44 }
 0x35b   : > { %v4785_v11 = vadd.f32 %v2783_v36, %v824_v60  ;;  %v2785_v26 = vpop.f32.mrb[30].mxu0  ;;  %v2828_v24 = vpop.f32.mrb[30].mxu1  ;;  %v4795_v57 = vadd.f32 %v2826_v2, %v832_v28 }
 0x35c   : > { %v2859_v53 = vmax.f32 %v2857_v3, %v4779_v17  ;;  %v4791_v55 = vadd.f32 %v2785_v26, %v820_v8  ;;  %v2787_v61 = vpop.f32.mrb[31].mxu0  ;;  %v2830_v10 = vpop.f32.mrb[31].mxu1  ;;  %v4801_v34 = vadd.f32 %v2828_v24, %v828_v44  ;;  %v5036_v44 = vld [vmem:[#allocation20_spill] sm:$0xff] }
 0x35d   : > { %v2860_v42 = vmax.f32 %v2858_v21, %v4785_v11  ;;  %v4797_v5 = vadd.f32 %v2787_v61, %v824_v60  ;;  %v4805_v3 = vadd.f32 %v2830_v10, %v832_v28  ;;  %v5038_v61 = vld [vmem:[#allocation21_spill] sm:$0xff] }
 0x35e   : > { %v2861_v36 = vmax.f32 %v2859_v53, %v4789_v12  ;;  %v2892_v31 = vmax.f32 %v2890_v15, %v4791_v55  ;;  %v5035_v15 = vld [vmem:[#allocation18_spill] sm:$0xff] }
 0x35f   : > { %v2862_v33 = vmax.f32 %v2860_v42, %v4795_v57  ;;  %v2893_v8 = vmax.f32 %v2891_v4, %v4797_v5  ;;  %v5037_v4 = vld [vmem:[#allocation19_spill] sm:$0xff] }
 0x360   : > { %v2894_v56 = vmax.f32 %v2892_v31, %v4801_v34 }
 0x361   : > { %v2895_v21 = vmax.f32 %v2893_v8, %v4805_v3  ;;  %v2863_v2 = vmax.f32 %v2861_v36, %v2862_v33  ;;  %v5039_v36 = vld [vmem:[#allocation24_spill] sm:$0xff] }
 0x363   : > { %2864 = vmax.xlane.f32.xlu0 %v2863_v2  ;;  %v2896_v60 = vmax.f32 %v2894_v56, %v2895_v21  ;;  %v5040_v56 = vld [vmem:[#allocation27_spill] sm:$0xff] }
 0x365   : > { %2897 = vmax.xlane.f32.xlu1 %v2896_v60  ;;  %v5041_v60 = vld [vmem:[#allocation30_spill] sm:$0xff] }
 0x3f0   : > { %v4809_v26 = vpop.xlane.xlu0 %2864 }
 0x3f1   : > { %v2899_v24 = vsub.f32 %v5035_v15, %v4809_v26  ;;  %v2900_v53 = vsub.f32 %v5036_v44, %v4809_v26  ;;  %v2901_v28 = vsub.f32 %v5037_v4, %v4809_v26  ;;  %v2902_v10 = vsub.f32 %v5038_v61, %v4809_v26 }
 0x3f2   : > { %v2903_v33 = vsub.f32 %v5039_v36, %v4809_v26  ;;  %v2904_v21 = vsub.f32 %v5040_v56, %v4809_v26  ;;  %v2905_v15 = vsub.f32 %v5041_v60, %v4809_v26  ;;  %v2906_v4 = vsub.f32 %v4584_v43, %v4809_v26 }
 0x3f3   : > { %v2963_v42 = vmul.f32 1.442695, %v2899_v24  ;;  %v2965_v31 = vmul.f32 1.442695, %v2900_v53  ;;  %v2967_v8 = vmul.f32 1.442695, %v2901_v28  ;;  %v2907_v53 = vsub.f32 %v4576_v46, %v4809_v26 }
 0x3f4   : > { %v2969_v2 = vmul.f32 1.442695, %v2902_v10  ;;  %v2971_v44 = vmul.f32 1.442695, %v2903_v33  ;;  %v2973_v24 = vmul.f32 1.442695, %v2904_v21  ;;  %v2908_v61 = vsub.f32 %v4588_v18, %v4809_v26 }
 0x3f5   : > { %3680 = vpow2.f32 %v2963_v42  ;;  %v2975_v28 = vmul.f32 1.442695, %v2905_v15  ;;  %v2977_v10 = vmul.f32 1.442695, %v2906_v4  ;;  %v2909_v36 = vsub.f32 %v4621_v23, %v4809_v26 }
 0x3f6   : > { %3682 = vpow2.f32 %v2965_v31  ;;  %v2979_v33 = vmul.f32 1.442695, %v2907_v53  ;;  %v2910_v56 = vsub.f32 %v4629_v49, %v4809_v26  ;;  %v2981_v46 = vmul.f32 1.442695, %v2908_v61 }
 0x3f7   : > { %3684 = vpow2.f32 %v2967_v8  ;;  %v2911_v18 = vsub.f32 %v4625_v41, %v4809_v26  ;;  %v2983_v60 = vmul.f32 1.442695, %v2909_v36  ;;  %v2912_v23 = vsub.f32 %v4633_v35, %v4809_v26 }
 0x3f8   : > { %3686 = vpow2.f32 %v2969_v2  ;;  %v2985_v4 = vmul.f32 1.442695, %v2910_v56  ;;  %v2913_v49 = vsub.f32 %v4657_v51, %v4809_v26  ;;  %v2914_v41 = vsub.f32 %v4665_v48, %v4809_v26  ;;  %v5042_v56 = vld [vmem:[#allocation22_spill] sm:$0xff]  ;;  %v5043_v48 = vld [vmem:[#allocation25_spill] sm:$0xff] }
 0x3f9   : > { %3688 = vpow2.f32 %v2971_v44  ;;  %v2915_v35 = vsub.f32 %v4661_v62, %v4809_v26  ;;  %v2917_v62 = vsub.f32 %v4694_v29, %v4809_v26  ;;  %v2919_v29 = vsub.f32 %v4698_v30, %v4809_v26 }
 0x3fa   : > { %3690 = vpow2.f32 %v2973_v24  ;;  %v2991_v51 = vmul.f32 1.442695, %v2913_v49 }
 0x3fb   : > { %3692 = vpow2.f32 %v2975_v28  ;;  %v2987_v28 = vmul.f32 1.442695, %v2911_v18 }
 0x3fc   : > { %3694 = vpow2.f32 %v2977_v10 }
 0x3fd   : > { %3696 = vpow2.f32 %v2979_v33 }
 0x3fe   : > { %3698 = vpow2.f32 %v2981_v46 }
 0x3ff   : > { %v3681_v42 = vpop.eup %3680  ;;  %3700 = vpow2.f32 %v2983_v60  ;;  %v2995_v60 = vmul.f32 1.442695, %v2915_v35 }
 0x400   : > { %v3683_v31 = vpop.eup %3682  ;;  %3702 = vpow2.f32 %v2985_v4 }
 0x401   : > { %v3091_v43 = vadd.f32 %v3683_v31, %v3681_v42  ;;  %v3685_v8 = vpop.eup %3684  ;;  %v4841_v42 = vpop.xlane.xlu1 %2897  ;;  %v2989_v31 = vmul.f32 1.442695, %v2912_v23  ;;  %3704 = vpow2.f32 %v2987_v28  ;;  %v5044_v23 = vld [vmem:[#allocation23_spill] sm:$0xff] }
 0x402   : > { %v3687_v2 = vpop.eup %3686  ;;  %v2931_v46 = vsub.f32 %v5042_v56, %v4841_v42  ;;  %v2932_v18 = vsub.f32 %v5043_v48, %v4841_v42  ;;  %v2933_v4 = vsub.f32 %v5044_v23, %v4841_v42  ;;  %v2921_v48 = vsub.f32 %v4730_v25, %v4809_v26 }
 0x403   : > { %v3092_v21 = vadd.f32 %v3685_v8, %v3091_v43  ;;  %v3689_v44 = vpop.eup %3688  ;;  %v2916_v43 = vsub.f32 %v4669_v45, %v4809_v26  ;;  %3706 = vpow2.f32 %v2989_v31  ;;  %v2999_v31 = vmul.f32 1.442695, %v2917_v62 }
 0x404   : > { %v3691_v53 = vpop.eup %3690  ;;  %3708 = vpow2.f32 %v2991_v51  ;;  %v3027_v49 = vmul.f32 1.442695, %v2931_v46  ;;  %v2920_v51 = vsub.f32 %v4706_v47, %v4809_v26 }
 0x405   : > { %v3093_v15 = vadd.f32 %v3687_v2, %v3092_v21  ;;  %v3693_v10 = vpop.eup %3692  ;;  %v2993_v2 = vmul.f32 1.442695, %v2914_v41  ;;  %v2997_v45 = vmul.f32 1.442695, %v2916_v43  ;;  %v3029_v41 = vmul.f32 1.442695, %v2932_v18 }
 0x406   : > { %v3695_v33 = vpop.eup %3694  ;;  %v3003_v18 = vmul.f32 1.442695, %v2919_v29 }
 0x407   : > { %v3094_v24 = vadd.f32 %v3689_v44, %v3093_v15  ;;  %v3697_v21 = vpop.eup %3696  ;;  %3710 = vpow2.f32 %v2993_v2 }
 0x408   : > { %v3699_v44 = vpop.eup %3698  ;;  %3712 = vpow2.f32 %v2995_v60 }
 0x409   : > { %v3095_v61 = vadd.f32 %v3691_v53, %v3094_v24  ;;  %v2918_v24 = vsub.f32 %v4702_v20, %v4809_v26  ;;  %v3701_v28 = vpop.eup %3700  ;;  %3714 = vpow2.f32 %v2997_v45  ;;  %v3031_v20 = vmul.f32 1.442695, %v2933_v4 }
 0x40a   : > { %3716 = vpow2.f32 %v3027_v49  ;;  %v3005_v45 = vmul.f32 1.442695, %v2920_v51  ;;  %v3007_v49 = vmul.f32 1.442695, %v2921_v48  ;;  %v2941_v51 = vsub.f32 %v4638_v32, %v4841_v42 }
 0x40b   : > { %v3096_v36 = vadd.f32 %v3693_v10, %v3095_v61  ;;  %v5045_v61 = vld [vmem:[#allocation26_spill] sm:$0xff]  ;;  %3718 = vpow2.f32 %v3029_v41  ;;  %v2924_v41 = vsub.f32 %v4741_v6, %v4809_v26  ;;  %v2926_v6 = vsub.f32 %v4771_v27, %v4809_v26 }
 0x40c   : > { %v2934_v10 = vsub.f32 %v5045_v61, %v4841_v42  ;;  %3720 = vpow2.f32 %v2999_v31  ;;  %v2939_v61 = vsub.f32 %v4600_v50, %v4841_v42 }
 0x40d   : > { %v3097_v8 = vadd.f32 %v3695_v33, %v3096_v36  ;;  %v3703_v36 = vpop.eup %3702  ;;  %v5046_v33 = vld [vmem:[#allocation28_spill] sm:$0xff]  ;;  %3722 = vpow2.f32 %v3031_v20 }
 0x40e   : > { %v2935_v43 = vsub.f32 %v5046_v33, %v4841_v42  ;;  %v3705_v46 = vpop.eup %3704  ;;  %v3033_v30 = vmul.f32 1.442695, %v2934_v10  ;;  %v2925_v33 = vsub.f32 %v4766_v52, %v4809_v26  ;;  %v2927_v52 = vsub.f32 %v4779_v17, %v4809_v26 }
 0x40f   : > { %v3098_v15 = vadd.f32 %v3697_v21, %v3097_v8  ;;  %v3001_v8 = vmul.f32 1.442695, %v2918_v24  ;;  %v5047_v21 = vld [vmem:[#allocation29_spill] sm:$0xff]  ;;  %v3707_v60 = vpop.eup %3706  ;;  %v2938_v24 = vsub.f32 %v4609_v39, %v4841_v42 }
 0x410   : > { %v2936_v2 = vsub.f32 %v5047_v21, %v4841_v42  ;;  %v3035_v47 = vmul.f32 1.442695, %v2935_v43  ;;  %v3709_v4 = vpop.eup %3708 }
 0x411   : > { %v3099_v53 = vadd.f32 %v3699_v44, %v3098_v15  ;;  %v2937_v15 = vsub.f32 %v4597_v37, %v4841_v42  ;;  %v2922_v44 = vsub.f32 %v4737_v59, %v4809_v26  ;;  %3724 = vpow2.f32 %v3001_v8 }
 0x412   : > { %3726 = vpow2.f32 %v3033_v30  ;;  %v3037_v25 = vmul.f32 1.442695, %v2936_v2  ;;  %v3043_v8 = vmul.f32 1.442695, %v2939_v61  ;;  %v2942_v30 = vsub.f32 %v4646_v38, %v4841_v42 }
 0x413   : > { %v3100_v35 = vadd.f32 %v3701_v28, %v3099_v53  ;;  %v2923_v53 = vsub.f32 %v4734_v54, %v4809_v26  ;;  %3728 = vpow2.f32 %v3003_v18  ;;  %v3711_v28 = vpop.eup %3710  ;;  %v3039_v59 = vmul.f32 1.442695, %v2937_v15 }
 0x414   : > { %3730 = vpow2.f32 %v3035_v47  ;;  %v3713_v10 = vpop.eup %3712  ;;  %v3009_v39 = vmul.f32 1.442695, %v2922_v44  ;;  %v2940_v54 = vsub.f32 %v4612_v19, %v4841_v42  ;;  %v3013_v19 = vmul.f32 1.442695, %v2924_v41 }
 0x415   : > { %v3101_v56 = vadd.f32 %v3703_v36, %v3100_v35  ;;  %3732 = vpow2.f32 %v3005_v45  ;;  %v3715_v31 = vpop.eup %3714  ;;  %v3041_v35 = vmul.f32 1.442695, %v2938_v24  ;;  %v3011_v50 = vmul.f32 1.442695, %v2923_v53 }
 0x416   : > { %3734 = vpow2.f32 %v3037_v25  ;;  %v3717_v36 = vpop.eup %3716  ;;  %v3045_v48 = vmul.f32 1.442695, %v2940_v54  ;;  %v3015_v18 = vmul.f32 1.442695, %v2925_v33  ;;  %v2928_v15 = vsub.f32 %v4785_v11, %v4809_v26 }
 0x417   : > { %v3102_v62 = vadd.f32 %v3705_v46, %v3101_v56  ;;  %3736 = vpow2.f32 %v3007_v49  ;;  %v3719_v20 = vpop.eup %3718  ;;  %v2943_v47 = vsub.f32 %v4641_v63, %v4841_v42  ;;  %v3047_v44 = vmul.f32 1.442695, %v2941_v51 }
 0x418   : > { %3738 = vpow2.f32 %v3039_v59  ;;  %v3721_v56 = vpop.eup %3720  ;;  %v3124_v21 = vadd.f32 %v3719_v20, %v3717_v36  ;;  %v3017_v45 = vmul.f32 1.442695, %v2926_v6  ;;  %v2929_v24 = vsub.f32 %v4789_v12, %v4809_v26 }
 0x419   : > { %v3103_v23 = vadd.f32 %v3707_v60, %v3102_v62  ;;  %3740 = vpow2.f32 %v3009_v39  ;;  %v3723_v2 = vpop.eup %3722  ;;  %v2944_v25 = vsub.f32 %v4649_v1, %v4841_v42  ;;  %v3049_v53 = vmul.f32 1.442695, %v2942_v30 }
 0x41a   : > { %3742 = vpow2.f32 %v3041_v35  ;;  %v3125_v62 = vadd.f32 %v3723_v2, %v3124_v21  ;;  %v3019_v49 = vmul.f32 1.442695, %v2927_v52  ;;  %v2930_v61 = vsub.f32 %v4795_v57, %v4809_v26 }
 0x41b   : > { %v3104_v37 = vadd.f32 %v3709_v4, %v3103_v23  ;;  %v3725_v27 = vpop.eup %3724  ;;  %3744 = vpow2.f32 %v3011_v50  ;;  %v2945_v59 = vsub.f32 %v4674_v40, %v4841_v42  ;;  %v3021_v41 = vmul.f32 1.442695, %v2928_v15  ;;  %v5049_v40 = vld [vmem:[#allocation31_spill] sm:$0xff] }
 0x41c   : > { %v3727_v60 = vpop.eup %3726  ;;  %3746 = vpow2.f32 %v3043_v8  ;;  %v3053_v35 = vmul.f32 1.442695, %v2944_v25  ;;  %v3023_v33 = vmul.f32 1.442695, %v2929_v24  ;;  %v2947_v20 = vsub.f32 %v5049_v40, %v4841_v42  ;;  %v5051_v40 = vld [vmem:[#allocation10_spill] sm:$0xff] }
 0x41d   : > { %v3105_v29 = vadd.f32 %v3711_v28, %v3104_v37  ;;  %v3729_v17 = vpop.eup %3728  ;;  %3748 = vpow2.f32 %v3013_v19  ;;  %v3126_v23 = vadd.f32 %v3727_v60, %v3125_v62  ;;  %v3055_v6 = vmul.f32 1.442695, %v2945_v59 }
 0x41e   : > { %v3731_v4 = vpop.eup %3730  ;;  %3750 = vpow2.f32 %v3045_v48  ;;  %v3025_v8 = vmul.f32 1.442695, %v2930_v61  ;;  %v2948_v21 = vsub.f32 %v4685_v22, %v4841_v42  ;;  %v2950_v22 = vsub.f32 %v4719_v58, %v4841_v42 }
 0x41f   : > { %v3106_v43 = vadd.f32 %v3713_v10, %v3105_v29  ;;  %v3733_v11 = vpop.eup %3732  ;;  %3752 = vpow2.f32 %v3015_v18  ;;  %v3127_v37 = vadd.f32 %v3731_v4, %v3126_v23  ;;  %v3051_v10 = vmul.f32 1.442695, %v2943_v47 }
 0x420   : > { %v3735_v28 = vpop.eup %3734  ;;  %3754 = vpow2.f32 %v3047_v44  ;;  %v2949_v18 = vsub.f32 %v4711_v0, %v4841_v42  ;;  %v3061_v44 = vmul.f32 1.442695, %v2948_v21  ;;  %v2951_v4 = vsub.f32 %v4714_v14, %v4841_v42  ;;  %v5053_v21 = vld [vmem:[#allocation16_spill] sm:$0xff] }
 0x421   : > { %v3107_v46 = vadd.f32 %v3715_v31, %v3106_v43  ;;  %v3737_v12 = vpop.eup %3736  ;;  %3756 = vpow2.f32 %v3017_v45  ;;  %v3128_v39 = vadd.f32 %v3735_v28, %v3127_v37  ;;  %v5048_v31 = vld [vmem:[#allocation32_spill] sm:$0xff]  ;;  %v3065_v58 = vmul.f32 1.442695, %v2950_v22 }
 0x422   : > { %v3739_v29 = vpop.eup %3738  ;;  %v2946_v54 = vsub.f32 %v5048_v31, %v4841_v42  ;;  %3758 = vpow2.f32 %v3049_v53  ;;  %v3063_v0 = vmul.f32 1.442695, %v2949_v18  ;;  %v2953_v59 = vsub.f32 %v4745_v9, %v4841_v42 }
 0x423   : > { %v3108_v32 = vadd.f32 %v3721_v56, %v3107_v46  ;;  %v3741_v36 = vpop.eup %3740  ;;  %3760 = vpow2.f32 %v3019_v49  ;;  %v3129_v50 = vadd.f32 %v3739_v29, %v3128_v39  ;;  %v2952_v49 = vsub.f32 %v4722_v16, %v4841_v42  ;;  %v4926_v29 = vld [vmem:[%s4083_s30] sm:$0xff]  }
 0x424   : > { %v3743_v43 = vpop.eup %3742  ;;  %3762 = vpow2.f32 %v3051_v10  ;;  %v3057_v2 = vmul.f32 1.442695, %v2946_v54  ;;  %v3067_v14 = vmul.f32 1.442695, %v2951_v4  ;;  %v2954_v39 = vsub.f32 %v4753_v7, %v4841_v42 }
 0x425   : > { %v3109_v38 = vadd.f32 %v3725_v27, %v3108_v32  ;;  %v3745_v51 = vpop.eup %3744  ;;  %3764 = vpow2.f32 %v3021_v41  ;;  %v3130_v19 = vadd.f32 %v3743_v43, %v3129_v50  ;;  %v3059_v32 = vmul.f32 1.442695, %v2947_v20 }
 0x426   : > { %v3747_v46 = vpop.eup %3746  ;;  %3766 = vpow2.f32 %v3053_v35  ;;  %v3069_v16 = vmul.f32 1.442695, %v2952_v49  ;;  %v3163_v20 = vunpack.c.l.bf16 %v5051_v40  ;;  %v2958_v18 = vsub.f32 %v4783_v13, %v4841_v42 }
 0x427   : > { %v3110_v63 = vadd.f32 %v3729_v17, %v3109_v38  ;;  %v3749_v52 = vpop.eup %3748  ;;  %3768 = vpow2.f32 %v3023_v33  ;;  %v3131_v48 = vadd.f32 %v3747_v46, %v3130_v19  ;;  %v5050_v33 = vld [vmem:[#allocation14_spill] sm:$0xff]  ;;  %v2961_v13 = vsub.f32 %v4801_v34, %v4841_v42 }
 0x428   : > { %v3751_v27 = vpop.eup %3750  ;;  %3770 = vpow2.f32 %v3055_v6  ;;  %v2955_v9 = vsub.f32 %v5050_v33, %v4841_v42  ;;  %v3619_v6 = vunpack.c.l.bf16 %v4926_v29 }
 0x429   : > { %v3111_v1 = vadd.f32 %v3733_v11, %v3110_v63  ;;  %v3753_v62 = vpop.eup %3752  ;;  %3772 = vpow2.f32 %v3025_v8  ;;  %v3132_v15 = vadd.f32 %v3751_v27, %v3131_v48 }
 0x42a   : > { %v3755_v47 = vpop.eup %3754  ;;  %3774 = vpow2.f32 %v3057_v2  ;;  %v2957_v2 = vsub.f32 %v5053_v21, %v4841_v42  ;;  %v3169_v48 = vmul.f32 %v3619_v6, %v3163_v20 }
 0x42b   : > { %v3112_v57 = vadd.f32 %v3737_v12, %v3111_v1  ;;  %v3757_v17 = vpop.eup %3756  ;;  %v3133_v38 = vadd.f32 %v3755_v47, %v3132_v15  ;;  %3776 = vpow2.f32 %v3059_v32  ;;  %v2959_v15 = vsub.f32 %v4791_v55, %v4841_v42 }
 0x42c   : > { %v3759_v23 = vpop.eup %3758  ;;  %3778 = vpow2.f32 %v3061_v44  ;;  %v3079_v47 = vmul.f32 1.442695, %v2957_v2  ;;  %v2962_v55 = vsub.f32 %v4805_v3, %v4841_v42 }
 0x42d   : > { %v3113_v56 = vadd.f32 %v3741_v36, %v3112_v57  ;;  %v3761_v24 = vpop.eup %3760  ;;  %v3134_v53 = vadd.f32 %v3759_v23, %v3133_v38  ;;  %3780 = vpow2.f32 %v3063_v0  ;;  %v3071_v57 = vmul.f32 1.442695, %v2953_v59 }
 0x42e   : > { %v3763_v11 = vpop.eup %3762  ;;  %3782 = vpow2.f32 %v3065_v58  ;;  %v3083_v4 = vmul.f32 1.442695, %v2959_v15 }
 0x42f   : > { %v3114_v30 = vadd.f32 %v3745_v51, %v3113_v56  ;;  %v3765_v63 = vpop.eup %3764  ;;  %v3135_v28 = vadd.f32 %v3763_v11, %v3134_v53  ;;  %3784 = vpow2.f32 %v3067_v14  ;;  %v5052_v51 = vld [vmem:[#allocation11_spill] sm:$0xff]  ;;  %v3073_v56 = vmul.f32 1.442695, %v2954_v39 }
 0x430   : > { %v3767_v61 = vpop.eup %3766  ;;  %v2956_v8 = vsub.f32 %v5052_v51, %v4841_v42  ;;  %3786 = vpow2.f32 %v3069_v16 }
 0x431   : > { %v3115_v60 = vadd.f32 %v3749_v52, %v3114_v30  ;;  %v3769_v10 = vpop.eup %3768  ;;  %v3136_v41 = vadd.f32 %v3767_v61, %v3135_v28  ;;  %3788 = vpow2.f32 %v3071_v57  ;;  %v3075_v52 = vmul.f32 1.442695, %v2955_v9 }
 0x432   : > { %v3771_v1 = vpop.eup %3770  ;;  %3790 = vpow2.f32 %v3073_v56  ;;  %v3077_v32 = vmul.f32 1.442695, %v2956_v8 }
 0x433   : > { %v3116_v45 = vadd.f32 %v3753_v62, %v3115_v60  ;;  %v3773_v31 = vpop.eup %3772  ;;  %v3137_v35 = vadd.f32 %v3771_v1, %v3136_v41  ;;  %3792 = vpow2.f32 %v3075_v52 }
 0x434   : > { %v3775_v36 = vpop.eup %3774  ;;  %3794 = vpow2.f32 %v3077_v32 }
 0x435   : > { %v3117_v25 = vadd.f32 %v3757_v17, %v3116_v45  ;;  %v3138_v43 = vadd.f32 %v3775_v36, %v3137_v35  ;;  %v3777_v7 = vpop.eup %3776  ;;  %v2960_v17 = vsub.f32 %v4797_v5, %v4841_v42  ;;  %v3081_v45 = vmul.f32 1.442695, %v2958_v18 }
 0x436   : > { %v3779_v46 = vpop.eup %3778  ;;  %3796 = vpow2.f32 %v3079_v47  ;;  %v3087_v5 = vmul.f32 1.442695, %v2961_v13  ;;  %v3164_v35 = vunpack.c.h.bf16 %v5051_v40  ;;  %v3620_v36 = vunpack.c.h.bf16 %v4926_v29 }
 0x437   : > { %v3118_v37 = vadd.f32 %v3761_v24, %v3117_v25  ;;  %v3139_v19 = vadd.f32 %v3777_v7, %v3138_v43  ;;  %v3781_v27 = vpop.eup %3780  ;;  %3798 = vpow2.f32 %v3081_v45  ;;  %v3085_v25 = vmul.f32 1.442695, %v2960_v17 }
 0x438   : > { %v3783_v60 = vpop.eup %3782  ;;  %3800 = vpow2.f32 %v3083_v4  ;;  %v3170_v33 = vmul.f32 %v3620_v36, %v3164_v35 }
 0x439   : > { %v3119_v12 = vadd.f32 %v3765_v63, %v3118_v37  ;;  %v3140_v30 = vadd.f32 %v3779_v46, %v3139_v19  ;;  %v3785_v44 = vpop.eup %3784  ;;  %3802 = vpow2.f32 %v3085_v25  ;;  %v3089_v63 = vmul.f32 1.442695, %v2962_v55 }
 0x43a   : > { %v3787_v23 = vpop.eup %3786  ;;  %3804 = vpow2.f32 %v3087_v5 }
 0x43b   : > { %v3120_v54 = vadd.f32 %v3769_v10, %v3119_v12  ;;  %v3141_v62 = vadd.f32 %v3781_v27, %v3140_v30  ;;  %v3789_v24 = vpop.eup %3788  ;;  %3806 = vpow2.f32 %v3089_v63 }
 0x43c   : > { %v3791_v11 = vpop.eup %3790 }
 0x43d   : > { %v3121_v50 = vadd.f32 %v3773_v31, %v3120_v54  ;;  %v3142_v22 = vadd.f32 %v3783_v60, %v3141_v62  ;;  %v3793_v58 = vpop.eup %3792 }
 0x43e   : > { %v3795_v28 = vpop.eup %3794 }
 0x43f   : > { %3122 = vadd.xlane.f32.xlu0 %v3121_v50  ;;  %v3143_v38 = vadd.f32 %v3785_v44, %v3142_v22 }
 0x440   : > { %v3797_v61 = vpop.eup %3796 }
 0x441   : > { %v3144_v0 = vadd.f32 %v3787_v23, %v3143_v38  ;;  %v3799_v14 = vpop.eup %3798 }
 0x442   : > { %v3801_v3 = vpop.eup %3800 }
 0x443   : > { %3171 = vadd.xlane.f32.xlu0 %v3169_v48  ;;  %v3145_v53 = vadd.f32 %v3789_v24, %v3144_v0  ;;  %v3803_v41 = vpop.eup %3802 }
 0x444   : > { %v3805_v39 = vpop.eup %3804 }
 0x445   : > { %v3146_v49 = vadd.f32 %v3791_v11, %v3145_v53  ;;  %v3807_v31 = vpop.eup %3806 }
 0x447   : > { %v3147_v37 = vadd.f32 %v3793_v58, %v3146_v49 }
 0x449   : > { %v3148_v34 = vadd.f32 %v3795_v28, %v3147_v37 }
 0x44b   : > { %v3149_v59 = vadd.f32 %v3797_v61, %v3148_v34 }
 0x44d   : > { %v3150_v10 = vadd.f32 %v3799_v14, %v3149_v59 }
 0x44f   : > { %v3151_v12 = vadd.f32 %v3801_v3, %v3150_v10 }
 0x451   : > { %v3152_v1 = vadd.f32 %v3803_v41, %v3151_v12 }
 0x453   : > { %v3153_v16 = vadd.f32 %v3805_v39, %v3152_v1 }
 0x455   : > { %v3154_v54 = vadd.f32 %v3807_v31, %v3153_v16 }
 0x457   : > { %3155 = vadd.xlane.f32.xlu1 %v3154_v54 }
 0x45b   : > { %3173 = vadd.xlane.f32.xlu1 %v3170_v33 }
 0x4cc   : > { %v3123_v9 = vpop.xlane.xlu0 %3122 }
 0x4cd   : > { %3808 = vlog2.f32 %v3123_v9 }
 0x4d0   : > { %v3172_v40 = vpop.xlane.xlu0 %3171 }
 0x4d7   : > { %v3809_v57 = vpop.eup %3808 }
 0x4d8   : > { %v3158_v50 = vmul.f32 0.6931472, %v3809_v57 }
 0x4da   : > { %v3161_v43 = vadd.f32 %v3158_v50, %v4809_v26 }
 0x4dc   : > { %v3175_v20 = vsub.f32 %v3161_v43, %v3172_v40 }
 0x4de   : > { %3178 = vst.msk [vmem:[%s412_s25] sm:$0xff] %vm3177_vm0, %v3175_v20 }
 0x4e4   : > { %v3156_v29 = vpop.xlane.xlu1 %3155 }
 0x4e5   : > { %3810 = vlog2.f32 %v3156_v29 }
 0x4e8   : > { %v3174_v8 = vpop.xlane.xlu1 %3173 }
 0x4ef   : > { %v3811_v6 = vpop.eup %3810 }
 0x4f0   : > { %v3160_v7 = vmul.f32 0.6931472, %v3811_v6 }
 0x4f2   : > { %v3162_v51 = vadd.f32 %v3160_v7, %v4841_v42 }
 0x4f4   : > { %v3176_v56 = vsub.f32 %v3162_v51, %v3174_v8 }
 0x4f6   : > { %3179 = vst.msk [vmem:[%s412_s25 + $0x8] sm:$0xff] %vm3177_vm0, %v3176_v56 }
 0x4f7 PF: > { %s20_s20 = sadd.s32 1, %s3922_s20   ;;  %s5054_s15 = smov %s3906_s16 }
 0x4f8   : > { %p17_p6 = scmp.ge.s32.totalorder %s20_s20, 5   ;;  %s5055_s16 = smov %s3910_s17 }
 0x4f9   : > { %s5056_s17 = smov %s4002_s27  ;;  %s5057_s18 = smov %s3918_s19 }
 0x4fa   : > { %s5058_s19 = smov %s5060_s22  ;;  %19 = sbr.rel (!%p17_p6) target bundleno = 6 (0x6), region = 184 }
 0x501   :  { %3210 = vsyncpa [#allocation5], 1 }
 0x502   :  { %3212 = vsyncpa [#allocation5 + $0x1], 1 }
 0x503   :  { %3213 = vsyncpa [#allocation7], 1 }
 0x504   :  { %3215 = vsyncpa [#allocation7 + $0x1], 1 }

</bundles_post_ra>
